<compile_context>
chip_gen: v5e
topology: v5e:2x2
jax: 0.10.0
libtpu: 0.0.40
codegen_flags: <defaults>
</compile_context>

<pallas_src>
import functools
import math

import jax
import jax.numpy as jnp
from jax.experimental import pallas as pl
from jax.experimental.pallas import tpu as pltpu

EPS = 1e-10
LANE = 128
SUBLANE = 8
VMEM_LIMIT = 32 * 1024 * 1024      # explicit scoped-VMEM budget (fits v5e/v6e/v7x)


def _round_up(n, m):
    return ((n + m - 1) // m) * m


def _pick_block(n, candidates):
    for c in candidates:
        if n % c == 0:
            return c
    return n


# --------------------------------------------------------------------------
# Kernel 1: blocked attention pooling ("scp") with in-kernel embedding gather
# --------------------------------------------------------------------------
def pool_kernel(s_ref, m_ref, tab_ref, att_ref, o_ref, *,
                sets_per_block, pad_set_size, dp, dim, num_item):
    T, P, Dp = sets_per_block, pad_set_size, dp

    ids = s_ref[...]                          # (T*P, 1) int32 item indices
    mask3 = m_ref[...]                        # (T, P, 1) f32 in {0, 1}
    tab = tab_ref[...]                        # (num_item, 2*Dp) fused [center|radius]
    attp = att_ref[...]                       # (2, Dp): row0 center, row1 radius

    # ---- in-kernel gather: one-hot (T*P, num_item) @ table on the MXU ----
    # Table is fully VMEM-resident (constant index_map).  For very large item
    # vocabularies this would become a scalar-prefetch / manual-DMA gather.
    iota = jax.lax.broadcasted_iota(jnp.int32, (T * P, num_item), 1)
    onehot = (iota == ids).astype(jnp.float32)
    xf = jnp.dot(onehot, tab, preferred_element_type=jnp.float32)   # (T*P, 2*Dp)
    xf = xf.reshape(T, P, 2 * Dp)             # minor dim unchanged, P % 8 == 0
    xc = xf[:, :, :Dp]                        # (T, P, Dp) center items
    xr = xf[:, :, Dp:]                        # (T, P, Dp) radius items
    a_c = attp[0:1, :]                        # (1, Dp) -> broadcasts over (T, P, Dp)
    a_r = attp[1:2, :]

    neg = jnp.float32(-1e30)

    def two_stage_pool(x, a_row):
        # Batched (over T sets) equivalent of scatter_softmax / scatter_sum.
        att = jnp.sum(x * a_row, axis=2, keepdims=True)            # (T, P, 1)
        att = jnp.where(mask3 > 0, att, neg)
        w = jnp.exp(att - jnp.max(att, axis=1, keepdims=True)) * mask3
        # Invariant: every set (incl. padded rows) has >= 1 unmasked element, so
        # the denominator is never zero (wrapper enforces it).
        w = w / jnp.sum(w, axis=1, keepdims=True)
        a = jnp.sum(x * w, axis=1, keepdims=True)                  # (T, 1, Dp)
        att2 = jnp.sum(x * a, axis=2, keepdims=True)               # (T, P, 1)
        att2 = jnp.where(mask3 > 0, att2, neg)
        w2 = jnp.exp(att2 - jnp.max(att2, axis=1, keepdims=True)) * mask3
        w2 = w2 / jnp.sum(w2, axis=1, keepdims=True)
        return jnp.sum(x * w2, axis=1)                             # (T, Dp)

    emb_c = two_stage_pool(xc, a_c)
    emb_r = two_stage_pool(xr, a_r)

    size = jnp.sum(mask3, axis=1)                                  # (T, 1)  == |set|
    scale = jnp.exp(jnp.log(size) * jnp.float32(1.0 / dim))        # size**(1/dim), EUP

    # lane-dense (T, 2*Dp) output slab: [center | radius * size_reg]
    o_ref[:, :Dp] = emb_c
    o_ref[:, Dp:] = emb_r * scale


def attention_pool(S, M, center_w, radius_w, center_att, radius_att):
    num_sets, set_size = S.shape
    num_item, D = center_w.shape
    Dp = _round_up(D, LANE)                   # lane-pad hidden dim (zeros)
    P = _round_up(set_size, SUBLANE)          # sublane-pad set size (masked)
    Ns = _round_up(num_sets, SUBLANE)         # pad #sets to a multiple of 8

    # Sets per grid step.  VMEM budget per step ~ 2 * (T*P, 2*Dp) gathered block
    # + resident table; halve T for v7x (64 MiB VMEM) at real table sizes.
    T = _pick_block(Ns, (64, 32, 16, 8))
    if Ns == T and T > SUBLANE:
        T //= 2                               # >= 2 blocks so both v7x TCs get work

    # Fused, zero-lane-padded table and attention params (one-time, tiny).
    tab = jnp.zeros((num_item, 2 * Dp), jnp.float32)
    tab = tab.at[:, :D].set(center_w).at[:, Dp:Dp + D].set(radius_w)
    att = jnp.zeros((2, Dp), jnp.float32)
    att = att.at[0, :D].set(center_att).at[1, :D].set(radius_att)

    # Pad sets / masks.  Padded set rows get one valid (index-0) element so the
    # masked softmax never divides by zero; their outputs are sliced away.
    S_pad = jnp.zeros((Ns, P), jnp.int32).at[:num_sets, :set_size].set(
        S.astype(jnp.int32))
    M_pad = jnp.zeros((Ns, P), jnp.float32).at[:num_sets, :set_size].set(
        M.astype(jnp.float32))
    M_pad = M_pad.at[num_sets:, 0].set(1.0)

    s_flat = S_pad.reshape(Ns * P, 1)         # sublane-major indices
    m3 = M_pad.reshape(Ns, P, 1)              # mask already in (T, P, 1) layout

    kernel = functools.partial(pool_kernel, sets_per_block=T, pad_set_size=P,
                               dp=Dp, dim=D, num_item=num_item)
    out = pl.pallas_call(
        kernel,
        out_shape=jax.ShapeDtypeStruct((Ns, 2 * Dp), jnp.float32),
        grid=(Ns // T,),
        in_specs=[pl.BlockSpec((T * P, 1), lambda b: (b, 0)),
                  pl.BlockSpec((T, P, 1), lambda b: (b, 0, 0)),
                  pl.BlockSpec((num_item, 2 * Dp), lambda b: (0, 0)),
                  pl.BlockSpec((2, Dp), lambda b: (0, 0))],
        out_specs=pl.BlockSpec((T, 2 * Dp), lambda b: (b, 0)),
        compiler_params=pltpu.CompilerParams(
            dimension_semantics=("parallel",),
            vmem_limit_bytes=VMEM_LIMIT),
    )(s_flat, m3, tab, att)

    return out[:num_sets, :D], out[:num_sets, Dp:Dp + D]


# --------------------------------------------------------------------------
# Kernel 2: box volumes + normalisation + sum-MSE loss, blocked over the batch
# --------------------------------------------------------------------------
def box_loss_kernel(ec_ref, er_ref, ov_ref, out_ref, *, beta):
    @pl.when(pl.program_id(0) == 0)
    def _():
        out_ref[...] = jnp.zeros_like(out_ref)

    c_i, c_j, c_k = ec_ref[0], ec_ref[1], ec_ref[2]     # (Bt, D) leading-axis views
    r_i, r_j, r_k = er_ref[0], er_ref[1], er_ref[2]
    ov = ov_ref[...]                                     # (Bt, 7)

    m_i, m_j, m_k = c_i - r_i, c_j - r_j, c_k - r_k
    hi_i, hi_j, hi_k = c_i + r_i, c_j + r_j, c_k + r_k

    def softplus(x):   # torch.nn.functional.softplus(x, beta, threshold=20)
        bx = beta * x
        return jnp.where(bx > 20.0, x,
                         jnp.log1p(jnp.exp(jnp.minimum(bx, 20.0))) / beta)

    def logvol(lo, hi):
        return jnp.sum(jnp.log(softplus(hi - lo) + EPS), axis=1, keepdims=True)

    C_i = logvol(m_i, hi_i)
    C_j = logvol(m_j, hi_j)
    C_k = logvol(m_k, hi_k)
    C_ij = logvol(jnp.maximum(m_i, m_j), jnp.minimum(hi_i, hi_j))
    C_jk = logvol(jnp.maximum(m_j, m_k), jnp.minimum(hi_j, hi_k))
    C_ki = logvol(jnp.maximum(m_k, m_i), jnp.minimum(hi_k, hi_i))
    C_ijk = logvol(jnp.maximum(m_i, jnp.maximum(m_j, m_k)),
                   jnp.minimum(hi_i, jnp.minimum(hi_j, hi_k)))

    # Per-block stabiliser: pred is invariant to Z, so blocking over B is exact.
    Z = jnp.maximum(jnp.max(C_i), jnp.maximum(jnp.max(C_j), jnp.max(C_k)))
    E = [jnp.exp(c - Z) for c in (C_i, C_j, C_k, C_ij, C_jk, C_ki, C_ijk)]
    inv_sum = pl.reciprocal(E[0] + E[1] + E[2] + E[3] + E[4] + E[5] + E[6],
                            approx=True)                 # EUP slot

    loss = jnp.float32(0.0)
    for t in range(7):                                   # no lane-7 concatenate
        d = E[t] * inv_sum - ov[:, t:t + 1]
        loss = loss + jnp.sum(d * d)
    out_ref[...] = out_ref[...] + jnp.reshape(loss, (1, 1))


def box_loss(emb_c3, emb_r3, overlaps, beta):
    _, B, D = emb_c3.shape
    Bt = _pick_block(B, (512, 256, 128, 64, 32, 16, 8))  # falls back to Bt=B
    kernel = functools.partial(box_loss_kernel, beta=beta)
    out = pl.pallas_call(
        kernel,
        out_shape=jax.ShapeDtypeStruct((1, 1), jnp.float32),
        grid=(B // Bt,),
        in_specs=[pl.BlockSpec((3, Bt, D), lambda b: (0, b, 0)),
                  pl.BlockSpec((3, Bt, D), lambda b: (0, b, 0)),
                  pl.BlockSpec((Bt, 7), lambda b: (b, 0))],
        out_specs=pl.BlockSpec((1, 1), lambda b: (0, 0)),
        compiler_params=pltpu.CompilerParams(
            dimension_semantics=("arbitrary",),
            vmem_limit_bytes=VMEM_LIMIT),
    )(emb_c3, emb_r3, overlaps)
    return out[0, 0]


# --------------------------------------------------------------------------
# Full forward (glue + kernels)
# --------------------------------------------------------------------------
def set2box_forward(S, M, instances, overlaps, params, beta):
    center_w, radius_w, center_att, radius_att = params
    # Pool every set, then index by `instances` — numerically identical to the
    # torch.unique(return_inverse=True) path in embed_set.
    emb_center, emb_radius = attention_pool(S, M, center_w, radius_w,
                                            center_att, radius_att)
    emb_c3 = emb_center[instances.T]          # (3, B, D): triple axis leading
    emb_r3 = emb_radius[instances.T]
    return box_loss(emb_c3, emb_r3, overlaps, beta)


# --------------------------------------------------------------------------
# Pure-JAX reference (mirrors the PyTorch forward) for a sanity check
# --------------------------------------------------------------------------
def _reference_forward(S, M, instances, overlaps, params, beta):
    center_w, radius_w, center_att, radius_att = params
    Mf = M.astype(jnp.float32)

    def pool(table, a, size_reg):
        X = table[S]                                               # (Ns, P, D)
        att = jnp.sum(X * a[None, None, :], axis=2)
        att = jnp.where(Mf > 0, att, -1e30)
        w = jnp.exp(att - att.max(axis=1, keepdims=True)) * Mf
        w = w / w.sum(axis=1, keepdims=True)
        agg = jnp.sum(X * w[:, :, None], axis=1)
        att2 = jnp.sum(X * agg[:, None, :], axis=2)
        att2 = jnp.where(Mf > 0, att2, -1e30)
        w2 = jnp.exp(att2 - att2.max(axis=1, keepdims=True)) * Mf
        w2 = w2 / w2.sum(axis=1, keepdims=True)
        emb = jnp.sum(X * w2[:, :, None], axis=1)
        if size_reg:
            sizes = Mf.sum(axis=1, keepdims=True)
            emb = emb * sizes ** (1.0 / table.shape[1])
        return emb

    ec = pool(center_w, center_att, False)[instances]              # (B, 3, D)
    er = pool(radius_w, radius_att, True)[instances]
    c_i, c_j, c_k = ec[:, 0], ec[:, 1], ec[:, 2]
    r_i, r_j, r_k = er[:, 0], er[:, 1], er[:, 2]
    m_i, m_j, m_k = c_i - r_i, c_j - r_j, c_k - r_k
    M_i, M_j, M_k = c_i + r_i, c_j + r_j, c_k + r_k

    def sp(x):
        bx = beta * x
        return jnp.where(bx > 20.0, x,
                         jnp.log1p(jnp.exp(jnp.minimum(bx, 20.0))) / beta)

    def lv(lo, hi):
        return jnp.sum(jnp.log(sp(hi - lo) + EPS), axis=1)

    C = [lv(m_i, M_i), lv(m_j, M_j), lv(m_k, M_k),
         lv(jnp.maximum(m_i, m_j), jnp.minimum(M_i, M_j)),
         lv(jnp.maximum(m_j, m_k), jnp.minimum(M_j, M_k)),
         lv(jnp.maximum(m_k, m_i), jnp.minimum(M_k, M_i)),
         lv(jnp.maximum(m_i, jnp.maximum(m_j, m_k)),
            jnp.minimum(M_i, jnp.minimum(M_j, M_k)))]
    Z = jnp.maximum(jnp.max(C[0]), jnp.maximum(jnp.max(C[1]), jnp.max(C[2])))
    E = [jnp.exp(c - Z) for c in C]
    Ssum = E[0] + E[1] + E[2] + E[3] + E[4] + E[5] + E[6]
    pred = jnp.stack([e / Ssum for e in E], axis=1)
    return jnp.sum((pred - overlaps) ** 2)


if __name__ == "__main__":
    num_item, hidden_dim, beta = 32, 32, 1.0
    num_sets, max_set_size, batch = 8, 8, 4

    key = jax.random.PRNGKey(0)
    k1, k2, k3, k4, k5, k6, k7, k8 = jax.random.split(key, 8)

    # --- deterministic parameter init (mirrors model.__init__ / init_weights) ---
    center_w = 0.1 * jax.random.normal(k1, (num_item, hidden_dim), jnp.float32)
    center_w = center_w / jnp.maximum(
        jnp.linalg.norm(center_w, axis=1, keepdims=True), 1.0)
    radius_w = 0.1 * jax.random.normal(k2, (num_item, hidden_dim), jnp.float32)
    radius_w = radius_w / jnp.maximum(
        jnp.linalg.norm(radius_w, axis=1, keepdims=True), 1.0)
    radius_w = jnp.maximum(radius_w, EPS)                 # clamp(min=EPS)
    stdv = 1.0 / math.sqrt(hidden_dim)
    center_att = jax.random.uniform(k3, (hidden_dim,), jnp.float32, -stdv, stdv)
    radius_att = jax.random.uniform(k4, (hidden_dim,), jnp.float32, -stdv, stdv)
    params = (center_w, radius_w, center_att, radius_att)

    # --- deterministic inputs ---
    S = jax.random.randint(k5, (num_sets, max_set_size), 0, num_item, jnp.int32)
    M = (jax.random.uniform(k6, (num_sets, max_set_size)) < 0.7).astype(jnp.float32)
    M = M.at[:, 0].set(1.0)                               # every set non-empty
    instances = jax.random.randint(k7, (batch, 3), 0, num_sets, jnp.int32)
    overlaps = jax.random.uniform(k8, (batch, 7), jnp.float32)
    overlaps = overlaps / jnp.sum(overlaps, axis=1, keepdims=True)

    loss = set2box_forward(S, M, instances, overlaps, params, beta)
    loss = jax.block_until_ready(loss)
    assert jnp.isfinite(loss), f"non-finite loss: {loss}"

    ref = jax.block_until_ready(
        _reference_forward(S, M, instances, overlaps, params, beta))
    assert jnp.allclose(loss, ref, rtol=5e-2, atol=1e-3), (
        f"kernel loss {loss} vs reference {ref}")

    print("KERNEL_OK")
</pallas_src>

<mosaic_0001>
module attributes {stable_mosaic.version = 11 : i64} {
  func.func @pool_kernel(%arg0: i32, %arg1: memref<64x1xi32, #tpu.memory_space<vmem>>, %arg2: memref<8x8x1xf32, #tpu.memory_space<vmem>>, %arg3: memref<32x256xf32, #tpu.memory_space<vmem>>, %arg4: memref<2x128xf32, #tpu.memory_space<vmem>>, %arg5: memref<8x256xf32, #tpu.memory_space<vmem>>) attributes {dimension_semantics = [#tpu.dimension_semantics<parallel>], iteration_bounds = array<i64: 1>, scalar_prefetch = 0 : i64, scratch_operands = 0 : i64, tpu.core_type = #tpu.core_type<tc>, window_params = [{transform_indices = @transform_0, window_bounds = array<i64: 64, 1>}, {transform_indices = @transform_1, window_bounds = array<i64: 8, 8, 1>}, {pipeline_mode = #tpu.pipeline_mode<synchronous>, transform_indices = @transform_2, window_bounds = array<i64: 32, 256>}, {pipeline_mode = #tpu.pipeline_mode<synchronous>, transform_indices = @transform_3, window_bounds = array<i64: 2, 128>}, {transform_indices = @transform_4, window_bounds = array<i64: 8, 256>}]} {
    %c0 = arith.constant 0 : index
    %c0_0 = arith.constant 0 : index
    %0 = vector.load %arg1[%c0, %c0_0] : memref<64x1xi32, #tpu.memory_space<vmem>>, vector<64x1xi32>
    %c0_1 = arith.constant 0 : index
    %c0_2 = arith.constant 0 : index
    %c0_3 = arith.constant 0 : index
    %1 = vector.load %arg2[%c0_1, %c0_2, %c0_3] : memref<8x8x1xf32, #tpu.memory_space<vmem>>, vector<8x8x1xf32>
    %c0_4 = arith.constant 0 : index
    %c0_5 = arith.constant 0 : index
    %2 = vector.load %arg3[%c0_4, %c0_5] : memref<32x256xf32, #tpu.memory_space<vmem>>, vector<32x256xf32>
    %c0_6 = arith.constant 0 : index
    %c0_7 = arith.constant 0 : index
    %3 = vector.load %arg4[%c0_6, %c0_7] : memref<2x128xf32, #tpu.memory_space<vmem>>, vector<2x128xf32>
    %4 = tpu.iota {dimensions = array<i32: 1>} : vector<64x32xi32>
    %5 = vector.broadcast %0 : vector<64x1xi32> to vector<64x32xi32>
    %6 = arith.cmpi eq, %4, %5 : vector<64x32xi32>
    %7 = arith.extui %6 : vector<64x32xi1> to vector<64x32xi32>
    %8 = arith.sitofp %7 : vector<64x32xi32> to vector<64x32xf32>
    %cst = arith.constant dense<0.000000e+00> : vector<64x256xf32>
    %9 = tpu.matmul %8, %2, %cst {dimension_numbers = #tpu.dot_dimension_numbers<[1], [0], [0], [1], [0, 0, 1, 1], [], []>} : vector<64x32xf32>, vector<32x256xf32>, vector<64x256xf32> -> vector<64x256xf32>
    %10 = vector.shape_cast %9 : vector<64x256xf32> to vector<8x8x256xf32>
    %11 = vector.extract_strided_slice %10 {offsets = [0, 0, 0], sizes = [8, 8, 128], strides = [1, 1, 1]} : vector<8x8x256xf32> to vector<8x8x128xf32>
    %12 = vector.extract_strided_slice %10 {offsets = [0, 0, 128], sizes = [8, 8, 128], strides = [1, 1, 1]} : vector<8x8x256xf32> to vector<8x8x128xf32>
    %13 = vector.extract_strided_slice %3 {offsets = [0, 0], sizes = [1, 128], strides = [1, 1]} : vector<2x128xf32> to vector<1x128xf32>
    %14 = vector.extract_strided_slice %3 {offsets = [1, 0], sizes = [1, 128], strides = [1, 1]} : vector<2x128xf32> to vector<1x128xf32>
    %15 = vector.shape_cast %13 : vector<1x128xf32> to vector<1x1x128xf32>
    %16 = vector.broadcast %15 : vector<1x1x128xf32> to vector<8x8x128xf32>
    %17 = arith.mulf %11, %16 : vector<8x8x128xf32>
    %cst_8 = arith.constant dense<0.000000e+00> : vector<8x8xf32>
    %18 = vector.multi_reduction <add>, %17, %cst_8 [2] : vector<8x8x128xf32> to vector<8x8xf32>
    %19 = vector.shape_cast %18 : vector<8x8xf32> to vector<8x8x1xf32>
    %cst_9 = arith.constant 0.000000e+00 : f32
    %20 = vector.broadcast %cst_9 : f32 to vector<8x8x1xf32>
    %21 = arith.cmpf ogt, %1, %20 : vector<8x8x1xf32>
    %cst_10 = arith.constant -1.000000e+30 : f32
    %22 = vector.broadcast %cst_10 : f32 to vector<8x8x1xf32>
    %23 = arith.select %21, %19, %22 : vector<8x8x1xi1>, vector<8x8x1xf32>
    %cst_11 = arith.constant dense<0xFF800000> : vector<8x1xf32>
    %24 = vector.multi_reduction <maximumf>, %23, %cst_11 [1] : vector<8x8x1xf32> to vector<8x1xf32>
    %25 = vector.shape_cast %24 : vector<8x1xf32> to vector<8x1x1xf32>
    %26 = vector.broadcast %25 : vector<8x1x1xf32> to vector<8x8x1xf32>
    %27 = arith.subf %23, %26 : vector<8x8x1xf32>
    %28 = math.exp %27 : vector<8x8x1xf32>
    %29 = arith.mulf %28, %1 : vector<8x8x1xf32>
    %cst_12 = arith.constant dense<0.000000e+00> : vector<8x1xf32>
    %30 = vector.multi_reduction <add>, %29, %cst_12 [1] : vector<8x8x1xf32> to vector<8x1xf32>
    %31 = vector.shape_cast %30 : vector<8x1xf32> to vector<8x1x1xf32>
    %32 = vector.broadcast %31 : vector<8x1x1xf32> to vector<8x8x1xf32>
    %33 = arith.divf %29, %32 : vector<8x8x1xf32>
    %34 = vector.broadcast %33 : vector<8x8x1xf32> to vector<8x8x128xf32>
    %35 = arith.mulf %11, %34 : vector<8x8x128xf32>
    %cst_13 = arith.constant dense<0.000000e+00> : vector<8x128xf32>
    %36 = vector.multi_reduction <add>, %35, %cst_13 [1] : vector<8x8x128xf32> to vector<8x128xf32>
    %37 = vector.shape_cast %36 : vector<8x128xf32> to vector<8x1x128xf32>
    %38 = vector.broadcast %37 : vector<8x1x128xf32> to vector<8x8x128xf32>
    %39 = arith.mulf %11, %38 : vector<8x8x128xf32>
    %cst_14 = arith.constant dense<0.000000e+00> : vector<8x8xf32>
    %40 = vector.multi_reduction <add>, %39, %cst_14 [2] : vector<8x8x128xf32> to vector<8x8xf32>
    %41 = vector.shape_cast %40 : vector<8x8xf32> to vector<8x8x1xf32>
    %cst_15 = arith.constant 0.000000e+00 : f32
    %42 = vector.broadcast %cst_15 : f32 to vector<8x8x1xf32>
    %43 = arith.cmpf ogt, %1, %42 : vector<8x8x1xf32>
    %cst_16 = arith.constant -1.000000e+30 : f32
    %44 = vector.broadcast %cst_16 : f32 to vector<8x8x1xf32>
    %45 = arith.select %43, %41, %44 : vector<8x8x1xi1>, vector<8x8x1xf32>
    %cst_17 = arith.constant dense<0xFF800000> : vector<8x1xf32>
    %46 = vector.multi_reduction <maximumf>, %45, %cst_17 [1] : vector<8x8x1xf32> to vector<8x1xf32>
    %47 = vector.shape_cast %46 : vector<8x1xf32> to vector<8x1x1xf32>
    %48 = vector.broadcast %47 : vector<8x1x1xf32> to vector<8x8x1xf32>
    %49 = arith.subf %45, %48 : vector<8x8x1xf32>
    %50 = math.exp %49 : vector<8x8x1xf32>
    %51 = arith.mulf %50, %1 : vector<8x8x1xf32>
    %cst_18 = arith.constant dense<0.000000e+00> : vector<8x1xf32>
    %52 = vector.multi_reduction <add>, %51, %cst_18 [1] : vector<8x8x1xf32> to vector<8x1xf32>
    %53 = vector.shape_cast %52 : vector<8x1xf32> to vector<8x1x1xf32>
    %54 = vector.broadcast %53 : vector<8x1x1xf32> to vector<8x8x1xf32>
    %55 = arith.divf %51, %54 : vector<8x8x1xf32>
    %56 = vector.broadcast %55 : vector<8x8x1xf32> to vector<8x8x128xf32>
    %57 = arith.mulf %11, %56 : vector<8x8x128xf32>
    %cst_19 = arith.constant dense<0.000000e+00> : vector<8x128xf32>
    %58 = vector.multi_reduction <add>, %57, %cst_19 [1] : vector<8x8x128xf32> to vector<8x128xf32>
    %59 = vector.shape_cast %14 : vector<1x128xf32> to vector<1x1x128xf32>
    %60 = vector.broadcast %59 : vector<1x1x128xf32> to vector<8x8x128xf32>
    %61 = arith.mulf %12, %60 : vector<8x8x128xf32>
    %cst_20 = arith.constant dense<0.000000e+00> : vector<8x8xf32>
    %62 = vector.multi_reduction <add>, %61, %cst_20 [2] : vector<8x8x128xf32> to vector<8x8xf32>
    %63 = vector.shape_cast %62 : vector<8x8xf32> to vector<8x8x1xf32>
    %cst_21 = arith.constant 0.000000e+00 : f32
    %64 = vector.broadcast %cst_21 : f32 to vector<8x8x1xf32>
    %65 = arith.cmpf ogt, %1, %64 : vector<8x8x1xf32>
    %cst_22 = arith.constant -1.000000e+30 : f32
    %66 = vector.broadcast %cst_22 : f32 to vector<8x8x1xf32>
    %67 = arith.select %65, %63, %66 : vector<8x8x1xi1>, vector<8x8x1xf32>
    %cst_23 = arith.constant dense<0xFF800000> : vector<8x1xf32>
    %68 = vector.multi_reduction <maximumf>, %67, %cst_23 [1] : vector<8x8x1xf32> to vector<8x1xf32>
    %69 = vector.shape_cast %68 : vector<8x1xf32> to vector<8x1x1xf32>
    %70 = vector.broadcast %69 : vector<8x1x1xf32> to vector<8x8x1xf32>
    %71 = arith.subf %67, %70 : vector<8x8x1xf32>
    %72 = math.exp %71 : vector<8x8x1xf32>
    %73 = arith.mulf %72, %1 : vector<8x8x1xf32>
    %cst_24 = arith.constant dense<0.000000e+00> : vector<8x1xf32>
    %74 = vector.multi_reduction <add>, %73, %cst_24 [1] : vector<8x8x1xf32> to vector<8x1xf32>
    %75 = vector.shape_cast %74 : vector<8x1xf32> to vector<8x1x1xf32>
    %76 = vector.broadcast %75 : vector<8x1x1xf32> to vector<8x8x1xf32>
    %77 = arith.divf %73, %76 : vector<8x8x1xf32>
    %78 = vector.broadcast %77 : vector<8x8x1xf32> to vector<8x8x128xf32>
    %79 = arith.mulf %12, %78 : vector<8x8x128xf32>
    %cst_25 = arith.constant dense<0.000000e+00> : vector<8x128xf32>
    %80 = vector.multi_reduction <add>, %79, %cst_25 [1] : vector<8x8x128xf32> to vector<8x128xf32>
    %81 = vector.shape_cast %80 : vector<8x128xf32> to vector<8x1x128xf32>
    %82 = vector.broadcast %81 : vector<8x1x128xf32> to vector<8x8x128xf32>
    %83 = arith.mulf %12, %82 : vector<8x8x128xf32>
    %cst_26 = arith.constant dense<0.000000e+00> : vector<8x8xf32>
    %84 = vector.multi_reduction <add>, %83, %cst_26 [2] : vector<8x8x128xf32> to vector<8x8xf32>
    %85 = vector.shape_cast %84 : vector<8x8xf32> to vector<8x8x1xf32>
    %cst_27 = arith.constant 0.000000e+00 : f32
    %86 = vector.broadcast %cst_27 : f32 to vector<8x8x1xf32>
    %87 = arith.cmpf ogt, %1, %86 : vector<8x8x1xf32>
    %cst_28 = arith.constant -1.000000e+30 : f32
    %88 = vector.broadcast %cst_28 : f32 to vector<8x8x1xf32>
    %89 = arith.select %87, %85, %88 : vector<8x8x1xi1>, vector<8x8x1xf32>
    %cst_29 = arith.constant dense<0xFF800000> : vector<8x1xf32>
    %90 = vector.multi_reduction <maximumf>, %89, %cst_29 [1] : vector<8x8x1xf32> to vector<8x1xf32>
    %91 = vector.shape_cast %90 : vector<8x1xf32> to vector<8x1x1xf32>
    %92 = vector.broadcast %91 : vector<8x1x1xf32> to vector<8x8x1xf32>
    %93 = arith.subf %89, %92 : vector<8x8x1xf32>
    %94 = math.exp %93 : vector<8x8x1xf32>
    %95 = arith.mulf %94, %1 : vector<8x8x1xf32>
    %cst_30 = arith.constant dense<0.000000e+00> : vector<8x1xf32>
    %96 = vector.multi_reduction <add>, %95, %cst_30 [1] : vector<8x8x1xf32> to vector<8x1xf32>
    %97 = vector.shape_cast %96 : vector<8x1xf32> to vector<8x1x1xf32>
    %98 = vector.broadcast %97 : vector<8x1x1xf32> to vector<8x8x1xf32>
    %99 = arith.divf %95, %98 : vector<8x8x1xf32>
    %100 = vector.broadcast %99 : vector<8x8x1xf32> to vector<8x8x128xf32>
    %101 = arith.mulf %12, %100 : vector<8x8x128xf32>
    %cst_31 = arith.constant dense<0.000000e+00> : vector<8x128xf32>
    %102 = vector.multi_reduction <add>, %101, %cst_31 [1] : vector<8x8x128xf32> to vector<8x128xf32>
    %cst_32 = arith.constant dense<0.000000e+00> : vector<8x1xf32>
    %103 = vector.multi_reduction <add>, %1, %cst_32 [1] : vector<8x8x1xf32> to vector<8x1xf32>
    %104 = math.log %103 : vector<8x1xf32>
    %cst_33 = arith.constant 3.125000e-02 : f32
    %105 = vector.broadcast %cst_33 : f32 to vector<8x1xf32>
    %106 = arith.mulf %104, %105 : vector<8x1xf32>
    %107 = math.exp %106 : vector<8x1xf32>
    %c0_34 = arith.constant 0 : index
    %c0_35 = arith.constant 0 : index
    %108 = vector.load %arg5[%c0_34, %c0_35] : memref<8x256xf32, #tpu.memory_space<vmem>>, vector<8x128xf32>
    tpu.vector_store %arg5[%c0_34, %c0_35], %58 {strides = array<i32>} : memref<8x256xf32, #tpu.memory_space<vmem>>, vector<8x128xf32>,
    %109 = vector.broadcast %107 : vector<8x1xf32> to vector<8x128xf32>
    %110 = arith.mulf %102, %109 : vector<8x128xf32>
    %c0_36 = arith.constant 0 : index
    %c128 = arith.constant 128 : index
    %111 = vector.load %arg5[%c0_36, %c128] : memref<8x256xf32, #tpu.memory_space<vmem>>, vector<8x128xf32>
    tpu.vector_store %arg5[%c0_36, %c128], %110 {strides = array<i32>} : memref<8x256xf32, #tpu.memory_space<vmem>>, vector<8x128xf32>,
    return
  }
  func.func @transform_0(%arg0: i32) -> (i32, i32) {
    %c0_i32 = arith.constant 0 : i32
    %c0_i32_0 = arith.constant 0 : i32
    return %arg0, %c0_i32 : i32, i32
  }
  func.func @transform_1(%arg0: i32) -> (i32, i32, i32) {
    %c0_i32 = arith.constant 0 : i32
    %c0_i32_0 = arith.constant 0 : i32
    %c0_i32_1 = arith.constant 0 : i32
    return %arg0, %c0_i32, %c0_i32_0 : i32, i32, i32
  }
  func.func @transform_2(%arg0: i32) -> (i32, i32) {
    %c0_i32 = arith.constant 0 : i32
    %c0_i32_0 = arith.constant 0 : i32
    %c0_i32_1 = arith.constant 0 : i32
    return %c0_i32, %c0_i32_0 : i32, i32
  }
  func.func @transform_3(%arg0: i32) -> (i32, i32) {
    %c0_i32 = arith.constant 0 : i32
    %c0_i32_0 = arith.constant 0 : i32
    %c0_i32_1 = arith.constant 0 : i32
    return %c0_i32, %c0_i32_0 : i32, i32
  }
  func.func @transform_4(%arg0: i32) -> (i32, i32) {
    %c0_i32 = arith.constant 0 : i32
    %c0_i32_0 = arith.constant 0 : i32
    return %arg0, %c0_i32 : i32, i32
  }
}

</mosaic_0001>

<bundles_post_ra>
// kernel: tpu_custom_call.1
= control target key start
LH: loop header
LB: loop body
LE: loop exit
PB: predicated region body
PF: predicated region fallthrough
CT: control target
= control target key end

     0   :  { %v2212_v2 = vmov 0   ;;  %s3386_s0 = inlined_call_operand.vmem [shape: s32[64,1], index: 0, kind: input, shape index: {}]   ;;  %s3387_s1 = inlined_call_operand.vmem [shape: f32[8,8,1], index: 1, kind: input, shape index: {}]   ;;  %s3388_s2 = inlined_call_operand.vmem [shape: f32[32,256], index: 2, kind: input, shape index: {}]   ;;  %s3389_s3 = inlined_call_operand.vmem [shape: f32[2,128], index: 3, kind: input, shape index: {}]   ;;  %s3390_s4 = inlined_call_operand.hbm [shape: f32[8,256], index: 4, kind: output, shape index: {}]  }
   0x1   :  { %v23_v0 = vld [vmem:[%s3386_s0 + $0x28] sm:$0xff]  ;;  %v22_v1 = vld [vmem:[%s3386_s0 + $0x20] sm:$0xff]  ;;  %2016 = vset.pattern.permute.xlu1 %v2212_v2  ;;  %2015 = vset.pattern.permute.xlu0 %v2212_v2  ;;  %v24_v3 = vld [vmem:[%s3386_s0 + $0x30] sm:$0xff] }
   0x2   :  { %61 = vperm.xlu1 %2016, %v23_v0   ;;  %58 = vperm.xlu0 %2015, %v22_v1   ;;  %v40_v4 = vld [vmem:[%s3388_s2 + $0x30] sm:$0xff]  ;;  %v41_v5 = vld [vmem:[%s3388_s2 + $0x38] sm:$0xff]  ;;  %v38_v6 = vld [vmem:[%s3388_s2 + $0x20] sm:$0xff] }
   0x3   :  { %2017 = vset.pattern.permute.xlu2 %v2212_v2  ;;  %2004 = vmatpush.msra.mxu2 %v40_v4  ;;  %v39_v7 = vld [vmem:[%s3388_s2 + $0x28] sm:$0xff]  ;;  %v36_v8 = vld [vmem:[%s3388_s2 + $0x10] sm:$0xff] }
   0x4   :  { %64 = vperm.xlu2 %2017, %v24_v3   ;;  %2008 = vmatpush.msra.mxu3 %v41_v5 }
   0x5   :  { %9 = vsyncpa [#allocation3], 0  ;;  %2005 = vmatpush.msra.mxu2 %v38_v6  ;;  %v37_v9 = vld [vmem:[%s3388_s2 + $0x18] sm:$0xff]  ;;  %130 = vmatpush.msra.mxu0 %v40_v4  ;;  %v19_v10 = vld [vmem:[%s3386_s0 + $0x8] sm:$0xff]  ;;  %v43_v17 = vlaneseq  ;;  %vm93_vm0 = vcmask 261120   ;;  %v2213_v21 = vmov 0.0  }
   0x6   :  { %2009 = vmatpush.msra.mxu3 %v39_v7  ;;  %171 = vmatpush.msra.mxu1 %v41_v5  ;;  %v18_v11 = vld [vmem:[%s3386_s0] sm:$0xff]  ;;  %v20_v12 = vld [vmem:[%s3386_s0 + $0x10] sm:$0xff]  ;;  %v21_v13 = vld [vmem:[%s3386_s0 + $0x18] sm:$0xff]  ;;  %vm241_vm10 = vcmask 7168   ;;  %s1971_s26 = sshll.u32 %s3390_s4, 4  ;;  %s1972_s26 = int_to_ptr.hbm [resolvable:$true] %s1971_s26 }
   0x7   :  { %2006 = vmatpush.msra.mxu2 %v36_v8  ;;  %131 = vmatpush.msra.mxu0 %v38_v6  ;;  %v25_v14 = vld [vmem:[%s3386_s0 + $0x38] sm:$0xff]  ;;  %v34_v15 = vld [vmem:[%s3388_s2] sm:$0xff]  ;;  %v35_v16 = vld [vmem:[%s3388_s2 + $0x8] sm:$0xff]  ;;  %v44_v18 = vand.u32 127, %v43_v17 }
   0x8   :  { %2010 = vmatpush.msra.mxu3 %v37_v9  ;;  %172 = vmatpush.msra.mxu1 %v39_v7  ;;  %v42_v36 = vld [vmem:[%s3389_s3] sm:$0x3] }
   0x9   :  { %132 = vmatpush.msra.mxu0 %v36_v8  ;;  %2007 = vmatpush.msra.mxu2 %v34_v15  ;;  %v994_v37 = vperm.slane %v42_v36, 1  ;;  %v200_v40 = vperm.slane %v42_v36, 0  ;;  %v2358_v7 = vld [vmem:[%s3387_s1 + $0x20] sm:$0xff] }
   0xa   :  { %49 = vperm.xlu1 %2016, %v19_v10   ;;  %46 = vperm.xlu0 %2015, %v18_v11   ;;  %3410 = vst [vmem:[#allocation11_spill] sm:$0xff] %v2358_v7  ;;  %v2363_v8 = vld [vmem:[%s3387_s1] sm:$0xff]  ;;  %vm229_vm9 = vcmp.gt.f32.partialorder %v2358_v7, 0.0 }
   0xb   :  { %173 = vmatpush.msra.mxu1 %v37_v9  ;;  %2011 = vmatpush.msra.mxu3 %v35_v16  ;;  %3411 = vst [vmem:[#allocation12_spill] sm:$0xff] %v2363_v8  ;;  %vm225_vm11 = vcmp.gt.f32.partialorder %v2363_v8, 0.0 }
   0xc   :  { %52 = vperm.xlu2 %2017, %v20_v12   ;;  %133 = vmatpush.msra.mxu0 %v34_v15 }
   0xd   :  { %174 = vmatpush.msra.mxu1 %v35_v16 }
  0x12   :  { %55 = vperm.xlu1 %2016, %v21_v13   ;;  %67 = vperm.xlu0 %2015, %v25_v14  }
  0x5e   :  { %v65_v25 = vpop.permute.xlu2 %64 }
  0x5f   :  { %vm75_vm4 = vcmp.eq.s32.totalorder %v44_v18, %v65_v25 }
  0x60   :  { %v1986_v28 = vsel %vm75_vm4, 1.0, %v2213_v21 }
  0x66   :  { %v53_v30 = vpop.permute.xlu2 %52 }
  0x67   :  { %vm71_vm6 = vcmp.eq.s32.totalorder %v44_v18, %v53_v30 }
  0x68   :  { %v1982_v32 = vsel %vm71_vm6, 1.0, %v2213_v21 }
  0x74   :  { %v59_v19 = vpop.permute.xlu0 %58  ;;  %v62_v20 = vpop.permute.xlu1 %61 }
  0x75   :  { %vm73_vm1 = vcmp.eq.s32.totalorder %v44_v18, %v59_v19  ;;  %vm74_vm2 = vcmp.eq.s32.totalorder %v44_v18, %v62_v20 }
  0x76   :  { %v1984_v22 = vsel %vm73_vm1, 1.0, %v2213_v21  ;;  %v1985_v23 = vsel %vm74_vm2, 1.0, %v2213_v21 }
  0x77   :  { %1992 = vmatmul.msk.f32.vlgmr.msra.gmra.mxu2 %vm93_vm0, %v1984_v22  ;;  %2000 = vmatmul.msk.f32.vlgmr.msra.gmra.mxu3 %vm93_vm0, %v1984_v22 }
  0x7c   :  { %v47_v24 = vpop.permute.xlu0 %46  ;;  %v50_v27 = vpop.permute.xlu1 %49 }
  0x7d   :  { %vm69_vm3 = vcmp.eq.s32.totalorder %v44_v18, %v47_v24  ;;  %vm70_vm5 = vcmp.eq.s32.totalorder %v44_v18, %v50_v27 }
  0x7e   :  { %v1980_v26 = vsel %vm69_vm3, 1.0, %v2213_v21  ;;  %v1981_v29 = vsel %vm70_vm5, 1.0, %v2213_v21 }
  0x7f   :  { %1988 = vmatmul.msk.f32.vlgmr.msra.gmra.mxu0 %vm93_vm0, %v1980_v26  ;;  %1993 = vmatmul.msk.f32.gmra.mxu2 %vm93_vm0, %v1985_v23 }
  0x80   :  { %1996 = vmatmul.msk.f32.vlgmr.msra.gmra.mxu1 %vm93_vm0, %v1980_v26  ;;  %2001 = vmatmul.msk.f32.gmra.mxu3 %vm93_vm0, %v1985_v23 }
  0x84   :  { %v68_v31 = vpop.permute.xlu0 %67  ;;  %v56_v34 = vpop.permute.xlu1 %55 }
  0x85   :  { %vm76_vm7 = vcmp.eq.s32.totalorder %v44_v18, %v68_v31  ;;  %vm72_vm8 = vcmp.eq.s32.totalorder %v44_v18, %v56_v34  ;;  %v2379_v18 = vld [vmem:[%s3387_s1 + $0x8] sm:$0xff] }
  0x86   :  { %v1987_v33 = vsel %vm76_vm7, 1.0, %v2213_v21  ;;  %v1983_v35 = vsel %vm72_vm8, 1.0, %v2213_v21  ;;  %vm226_vm12 = vcmp.gt.f32.partialorder %v2379_v18, 0.0 }
  0x87   :  { %1989 = vmatmul.msk.f32.gmra.mxu0 %vm93_vm0, %v1981_v29  ;;  %1994 = vmatmul.msk.f32.gmra.mxu2 %vm93_vm0, %v1986_v28 }
  0x88   :  { %1997 = vmatmul.msk.f32.gmra.mxu1 %vm93_vm0, %v1981_v29  ;;  %2002 = vmatmul.msk.f32.gmra.mxu3 %vm93_vm0, %v1986_v28 }
  0x8f   :  { %1990 = vmatmul.msk.f32.gmra.mxu0 %vm93_vm0, %v1982_v32  ;;  %1995 = vmatmul.msk.f32.gmra.mxu2 %vm93_vm0, %v1987_v33 }
  0x90   :  { %1998 = vmatmul.msk.f32.gmra.mxu1 %vm93_vm0, %v1982_v32  ;;  %2003 = vmatmul.msk.f32.gmra.mxu3 %vm93_vm0, %v1987_v33 }
  0x97   :  { %1991 = vmatmul.msk.f32.gmra.mxu0 %vm93_vm0, %v1983_v35 }
  0x98   :  { %1999 = vmatmul.msk.f32.gmra.mxu1 %vm93_vm0, %v1983_v35 }
  0xfa   :  { %v2307_v38 = vpop.f32.mrf.mxu3  ;;  %v2315_v44 = vpop.f32.mrf.mxu2 }
  0xfb   :  { %3404 = vst [vmem:[#allocation5_spill] sm:$0xff] %v2307_v38  ;;  %v999_v39 = vmul.f32 %v994_v37, %v2307_v38  ;;  %v205_v53 = vmul.f32 %v200_v40, %v2315_v44 }
  0xfc   :  { %v2310_v41 = vpop.f32.mrf.mxu0 }
  0xfd   :  { %v2312_v42 = vpop.f32.mrf.mxu1  ;;  %1011 = vadd.xlane.f32.xlu1 %v999_v39  ;;  %v201_v43 = vmul.f32 %v200_v40, %v2310_v41 }
  0xfe   :  { %v995_v47 = vmul.f32 %v994_v37, %v2312_v42 }
  0xff   :  { %209 = vadd.xlane.f32.xlu2 %v201_v43 }
 0x102   :  { %v2326_v51 = vpop.f32.mrf.mxu2 }
 0x103   :  { %v2324_v50 = vpop.f32.mrf.mxu3  ;;  %v206_v54 = vmul.f32 %v200_v40, %v2326_v51 }
 0x104   :  { %v2317_v45 = vpop.f32.mrf.mxu0  ;;  %3405 = vst [vmem:[#allocation6_spill] sm:$0xff] %v2324_v50  ;;  %v1000_v1 = vmul.f32 %v994_v37, %v2324_v50 }
 0x105   :  { %v2319_v46 = vpop.f32.mrf.mxu1  ;;  %v202_v48 = vmul.f32 %v200_v40, %v2317_v45 }
 0x106   :  { %v996_v49 = vmul.f32 %v994_v37, %v2319_v46 }
 0x107   :  { %1003 = vadd.xlane.f32.xlu2 %v995_v47  ;;  %211 = vadd.xlane.f32.xlu0 %v202_v48 }
 0x108   :  { %1005 = vadd.xlane.f32.xlu1 %v996_v49  ;;  %v2408_v49 = vld [vmem:[%s3387_s1 + $0x28] sm:$0xff] }
 0x109   :  { %vm230_vm14 = vcmp.gt.f32.partialorder %v2408_v49, 0.0 }
 0x10a   :  { %v2337_v58 = vpop.f32.mrf.mxu2 }
 0x10b   :  { %v2335_v57 = vpop.f32.mrf.mxu3  ;;  %v207_v62 = vmul.f32 %v200_v40, %v2337_v58 }
 0x10c   :  { %v2328_v52 = vpop.f32.mrf.mxu0  ;;  %3407 = vst [vmem:[#allocation8_spill] sm:$0xff] %v2335_v57  ;;  %v1001_v6 = vmul.f32 %v994_v37, %v2335_v57 }
 0x10d   :  { %v203_v55 = vmul.f32 %v200_v40, %v2328_v52  ;;  %v2333_v56 = vpop.f32.mrf.mxu1 }
 0x10e   :  { %3406 = vst [vmem:[#allocation7_spill] sm:$0xff] %v2333_v56  ;;  %v997_v60 = vmul.f32 %v994_v37, %v2333_v56 }
 0x10f   :  { %217 = vadd.xlane.f32.xlu2 %v205_v53  ;;  %219 = vadd.xlane.f32.xlu0 %v206_v54 }
 0x110   :  { %213 = vadd.xlane.f32.xlu1 %v203_v55 }
 0x112   :  { %v2351_v4 = vpop.f32.mrf.mxu2 }
 0x113   :  { %v2346_v0 = vpop.f32.mrf.mxu3  ;;  %v208_v5 = vmul.f32 %v200_v40, %v2351_v4 }
 0x114   :  { %v2339_v59 = vpop.f32.mrf.mxu0  ;;  %3409 = vst [vmem:[#allocation10_spill] sm:$0xff] %v2346_v0  ;;  %v1002_v3 = vmul.f32 %v994_v37, %v2346_v0 }
 0x115   :  { %v204_v61 = vmul.f32 %v200_v40, %v2339_v59  ;;  %v2344_v63 = vpop.f32.mrf.mxu1 }
 0x116   :  { %3408 = vst [vmem:[#allocation9_spill] sm:$0xff] %v2344_v63  ;;  %v998_v2 = vmul.f32 %v994_v37, %v2344_v63  ;;  %v2403_v37 = vld [vmem:[%s3387_s1 + $0x10] sm:$0xff] }
 0x117   :  { %1007 = vadd.xlane.f32.xlu0 %v997_v60  ;;  %215 = vadd.xlane.f32.xlu2 %v204_v61  ;;  %3412 = vst [vmem:[#allocation13_spill] sm:$0xff] %v2403_v37  ;;  %vm227_vm13 = vcmp.gt.f32.partialorder %v2403_v37, 0.0 }
 0x118   :  { %221 = vadd.xlane.f32.xlu1 %v207_v62 }
 0x11f   :  { %1013 = vadd.xlane.f32.xlu0 %v1000_v1  ;;  %1009 = vadd.xlane.f32.xlu2 %v998_v2 }
 0x120   :  { %1017 = vadd.xlane.f32.xlu1 %v1002_v3 }
 0x127   :  { %223 = vadd.xlane.f32.xlu2 %v208_v5 }
 0x12f   :  { %1015 = vadd.xlane.f32.xlu2 %v1001_v6  ;;  %v2419_v6 = vld [vmem:[%s3387_s1 + $0x18] sm:$0xff] }
 0x130   :  { %vm228_vm15 = vcmp.gt.f32.partialorder %v2419_v6, 0.0 }
 0x170   :  { %v1012_v9 = vpop.xlane.xlu1 %1011 }
 0x171   :  { %v2369_v10 = vsel %vm229_vm9, %v1012_v9, -1e+30 }
 0x172   :  { %v1055_v11 = vsel %vm241_vm10, %v2369_v10, -inf  ;;  %v210_v12 = vpop.xlane.xlu2 %209 }
 0x173   :  { %v1056_v13 = vrot.slane %v1055_v11, 4  ;;  %v233_v14 = vsel %vm225_vm11, %v210_v12, -1e+30 }
 0x174   :  { %v242_v15 = vsel %vm241_vm10, %v233_v14, -inf }
 0x175   :  { %v1057_v16 = vmax.f32 %v1055_v11, %v1056_v13  ;;  %v243_v17 = vrot.slane %v242_v15, 4 }
 0x177   :  { %v1058_v19 = vrot.slane %v1057_v16, 2  ;;  %v244_v20 = vmax.f32 %v242_v15, %v243_v17 }
 0x179   :  { %v245_v21 = vrot.slane %v244_v20, 2  ;;  %v1059_v24 = vmax.f32 %v1057_v16, %v1058_v19 }
 0x17a   :  { %v1004_v22 = vpop.xlane.xlu2 %1003  ;;  %v212_v23 = vpop.xlane.xlu0 %211 }
 0x17b   :  { %v246_v25 = vmax.f32 %v244_v20, %v245_v21  ;;  %v1006_v26 = vpop.xlane.xlu1 %1005  ;;  %v2384_v27 = vsel %vm225_vm11, %v1004_v22, -1e+30  ;;  %v2388_v28 = vsel %vm226_vm12, %v212_v23, -1e+30  ;;  %v1060_v39 = vrot.slane %v1059_v24, 1 }
 0x17c   :  { %v2392_v29 = vsel %vm226_vm12, %v1006_v26, -1e+30  ;;  %v1027_v30 = vsel %vm241_vm10, %v2384_v27, -inf  ;;  %v249_v31 = vsel %vm241_vm10, %v2388_v28, -inf }
 0x17d   :  { %v247_v32 = vrot.slane %v246_v25, 1  ;;  %v1034_v33 = vsel %vm241_vm10, %v2392_v29, -inf  ;;  %v1028_v34 = vrot.slane %v1027_v30, 4  ;;  %v250_v36 = vrot.slane %v249_v31, 4 }
 0x17e   :  { %v1035_v35 = vrot.slane %v1034_v33, 4  ;;  %v1061_v1 = vmax.f32 %v1059_v24, %v1060_v39 }
 0x17f   :  { %v248_v40 = vmax.f32 %v246_v25, %v247_v32  ;;  %v1029_v43 = vmax.f32 %v1027_v30, %v1028_v34  ;;  %v251_v48 = vmax.f32 %v249_v31, %v250_v36  ;;  %v2440_v25 = vld [vmem:[%s3387_s1 + $0x30] sm:$0xff]  ;;  %v2445_v32 = vld [vmem:[%s3387_s1 + $0x38] sm:$0xff] }
 0x180   :  { %v1036_v47 = vmax.f32 %v1034_v33, %v1035_v35  ;;  %v1087_v21 = vsub.f32 %v2369_v10, %v1061_v1  ;;  %vm231_vm0 = vcmp.gt.f32.partialorder %v2440_v25, 0.0  ;;  %vm3395_vm1 = vcmp.gt.f32.partialorder %v2445_v32, 0.0 }
 0x181   :  { %v298_v53 = vsub.f32 %v233_v14, %v248_v40  ;;  %v1030_v54 = vrot.slane %v1029_v43, 2  ;;  %v252_v60 = vrot.slane %v251_v48, 2 }
 0x182   :  { %v1037_v55 = vrot.slane %v1036_v47, 2  ;;  %v218_v61 = vpop.xlane.xlu2 %217  ;;  %v220_v62 = vpop.xlane.xlu0 %219 }
 0x183   :  { %v1031_v2 = vmax.f32 %v1029_v43, %v1030_v54  ;;  %v2413_v3 = vsel %vm229_vm9, %v218_v61, -1e+30  ;;  %v214_v5 = vpop.xlane.xlu1 %213  ;;  %v306_v9 = vmul.f32 1.442695, %v298_v53  ;;  %v253_v17 = vmax.f32 %v251_v48, %v252_v60 }
 0x184   :  { %v1038_v11 = vmax.f32 %v1036_v47, %v1037_v55  ;;  %v270_v12 = vsel %vm241_vm10, %v2413_v3, -inf  ;;  %v2425_v13 = vsel %vm227_vm13, %v214_v5, -1e+30  ;;  %v2431_v20 = vsel %vm230_vm14, %v220_v62, -1e+30 }
 0x185   :  { %v1032_v14 = vrot.slane %v1031_v2, 1  ;;  %v271_v15 = vrot.slane %v270_v12, 4  ;;  %v256_v16 = vsel %vm241_vm10, %v2425_v13, -inf  ;;  %v277_v24 = vsel %vm241_vm10, %v2431_v20, -inf }
 0x186   :  { %v257_v19 = vrot.slane %v256_v16, 4  ;;  %v1039_v22 = vrot.slane %v1038_v11, 1  ;;  %2018 = vpow2.f32 %v306_v9  ;;  %v278_v31 = vrot.slane %v277_v24, 4 }
 0x187   :  { %v272_v23 = vmax.f32 %v270_v12, %v271_v15  ;;  %v1033_v26 = vmax.f32 %v1031_v2, %v1032_v14  ;;  %v254_v33 = vrot.slane %v253_v17, 1  ;;  %v1099_v53 = vmul.f32 1.442695, %v1087_v21 }
 0x188   :  { %v258_v30 = vmax.f32 %v256_v16, %v257_v19  ;;  %v279_v35 = vmax.f32 %v277_v24, %v278_v31  ;;  %v1040_v40 = vmax.f32 %v1038_v11, %v1039_v22 }
 0x189   :  { %v273_v10 = vrot.slane %v272_v23, 2  ;;  %v1083_v54 = vsub.f32 %v2384_v27, %v1033_v26  ;;  %v2464_v9 = vmax.f32 %v253_v17, %v254_v33  ;;  %2020 = vpow2.f32 %v1099_v53 }
 0x18a   :  { %v259_v34 = vrot.slane %v258_v30, 2  ;;  %v216_v36 = vpop.xlane.xlu2 %215  ;;  %v1008_v39 = vpop.xlane.xlu0 %1007  ;;  %v280_v60 = vrot.slane %v279_v35, 2  ;;  %v1084_v14 = vsub.f32 %v2392_v29, %v1040_v40 }
 0x18b   :  { %v274_v43 = vmax.f32 %v272_v23, %v273_v10  ;;  %v222_v47 = vpop.xlane.xlu1 %221  ;;  %v2450_v48 = vsel %vm228_vm15, %v216_v36, -1e+30  ;;  %v2462_v2 = vsel %vm227_vm13, %v1008_v39, -1e+30  ;;  %v1091_v21 = vmul.f32 1.442695, %v1083_v54 }
 0x18c   :  { %v260_v55 = vmax.f32 %v258_v30, %v259_v34  ;;  %v2456_v62 = vsel %vm231_vm0, %v222_v47, -1e+30  ;;  %v263_v1 = vsel %vm241_vm10, %v2450_v48, -inf  ;;  %v2019_v5 = vpop.eup %2018  ;;  %v281_v12 = vmax.f32 %v279_v35, %v280_v60 }
 0x18d   :  { %v275_v61 = vrot.slane %v274_v43, 1  ;;  %v284_v27 = vsel %vm241_vm10, %v2456_v62, -inf  ;;  %v264_v19 = vrot.slane %v263_v1, 4  ;;  %v1041_v24 = vsel %vm241_vm10, %v2462_v2, -inf }
 0x18e   :  { %v261_v11 = vrot.slane %v260_v55, 1  ;;  %v285_v16 = vrot.slane %v284_v27, 4  ;;  %v282_v23 = vrot.slane %v281_v12, 1  ;;  %v1042_v17 = vrot.slane %v1041_v24, 4 }
 0x18f   :  { %v276_v15 = vmax.f32 %v274_v43, %v275_v61  ;;  %v265_v30 = vmax.f32 %v263_v1, %v264_v19  ;;  %v2472_v31 = vmul.f32 %v2019_v5, %v2363_v8  ;;  %v299_v10 = vsub.f32 %v2388_v28, %v2464_v9 }
 0x190   :  { %v262_v22 = vmax.f32 %v260_v55, %v261_v11  ;;  %v286_v26 = vmax.f32 %v284_v27, %v285_v16  ;;  %v283_v33 = vmax.f32 %v281_v12, %v282_v23  ;;  %v1093_v35 = vmul.f32 1.442695, %v1084_v14 }
 0x191   :  { %v302_v29 = vsub.f32 %v2413_v3, %v276_v15  ;;  %v266_v39 = vrot.slane %v265_v30, 2  ;;  %v1043_v40 = vmax.f32 %v1041_v24, %v1042_v17  ;;  %2022 = vpow2.f32 %v1091_v21  ;;  %v2493_v15 = vpop.eup %2020 }
 0x192   :  { %v1010_v34 = vpop.xlane.xlu2 %1009  ;;  %v287_v36 = vrot.slane %v286_v26, 2  ;;  %v300_v47 = vsub.f32 %v2425_v13, %v262_v22  ;;  %v1014_v60 = vpop.xlane.xlu0 %1013  ;;  %v330_v61 = vsel %vm241_vm10, %v2472_v31, 0.0  ;;  %v303_v5 = vsub.f32 %v2431_v20, %v283_v33 }
 0x193   :  { %v1018_v43 = vpop.xlane.xlu1 %1017  ;;  %v2480_v54 = vsel %vm228_vm15, %v1010_v34, -1e+30  ;;  %v267_v3 = vmax.f32 %v265_v30, %v266_v39  ;;  %v1044_v55 = vrot.slane %v1043_v40, 2  ;;  %v314_v1 = vmul.f32 1.442695, %v302_v29 }
 0x194   :  { %v2484_v53 = vsel %vm3395_vm1, %v1018_v43, -1e+30  ;;  %v288_v28 = vmax.f32 %v286_v26, %v287_v36  ;;  %v1048_v13 = vsel %vm241_vm10, %v2480_v54, -inf  ;;  %2024 = vpow2.f32 %v1093_v35 }
 0x195   :  { %v1076_v9 = vsel %vm241_vm10, %v2484_v53, -inf  ;;  %v268_v12 = vrot.slane %v267_v3, 1  ;;  %v1045_v27 = vmax.f32 %v1043_v40, %v1044_v55  ;;  %v1049_v14 = vrot.slane %v1048_v13, 4 }
 0x196   :  { %v289_v11 = vrot.slane %v288_v28, 1  ;;  %v1077_v16 = vrot.slane %v1076_v9, 4  ;;  %v2497_v19 = vsel %vm230_vm14, %v1014_v60, -1e+30  ;;  %v331_v21 = vrot.slane %v330_v61, 4 }
 0x197   :  { %v269_v22 = vmax.f32 %v267_v3, %v268_v12  ;;  %v1046_v23 = vrot.slane %v1045_v27, 1  ;;  %v1050_v24 = vmax.f32 %v1048_v13, %v1049_v14  ;;  %v2023_v26 = vpop.eup %2022  ;;  %v310_v30 = vmul.f32 1.442695, %v300_v47 }
 0x198   :  { %v290_v20 = vmax.f32 %v288_v28, %v289_v11  ;;  %v1078_v17 = vmax.f32 %v1076_v9, %v1077_v16  ;;  %v1062_v29 = vsel %vm241_vm10, %v2497_v19, -inf  ;;  %v332_v34 = vadd.f32 %v331_v21, %v330_v61 }
 0x199   :  { %2026 = vpow2.f32 %v314_v1  ;;  %v316_v35 = vmul.f32 1.442695, %v303_v5  ;;  %v1047_v36 = vmax.f32 %v1045_v27, %v1046_v23  ;;  %v1051_v39 = vrot.slane %v1050_v24, 2 }
 0x19a   :  { %v224_v33 = vpop.xlane.xlu2 %223  ;;  %v1079_v40 = vrot.slane %v1078_v17, 2  ;;  %v1063_v43 = vrot.slane %v1062_v29, 4  ;;  %v333_v3 = vrot.slane %v332_v34, 2  ;;  %v304_v55 = vsub.f32 %v2456_v62, %v290_v20  ;;  %v2510_v61 = vpop.eup %2024 }
 0x19b   :  { %v2503_v28 = vsel %vm3395_vm1, %v224_v33, -1e+30  ;;  %v301_v47 = vsub.f32 %v2450_v48, %v269_v22  ;;  %v1052_v60 = vmax.f32 %v1050_v24, %v1051_v39  ;;  %v2508_v13 = vmul.f32 %v2023_v26, %v2363_v8 }
 0x19c   :  { %v1080_v1 = vmax.f32 %v1078_v17, %v1079_v40  ;;  %v1064_v5 = vmax.f32 %v1062_v29, %v1063_v43  ;;  %v291_v9 = vsel %vm241_vm10, %v2503_v28, -inf  ;;  %v334_v11 = vadd.f32 %v333_v3, %v332_v34 }
 0x19d   :  { %v308_v12 = vmul.f32 1.442695, %v299_v10  ;;  %2028 = vpow2.f32 %v310_v30  ;;  %v1085_v27 = vsub.f32 %v2462_v2, %v1047_v36  ;;  %v292_v14 = vrot.slane %v291_v9, 4 }
 0x19e   :  { %v1053_v62 = vrot.slane %v1052_v60, 1  ;;  %v1081_v16 = vrot.slane %v1080_v1, 1  ;;  %v1065_v48 = vrot.slane %v1064_v5, 2  ;;  %v335_v21 = vrot.slane %v334_v11, 1 }
 0x19f   :  { %v2027_v20 = vpop.eup %2026  ;;  %2030 = vpow2.f32 %v316_v35  ;;  %v318_v22 = vmul.f32 1.442695, %v304_v55  ;;  %v293_v23 = vmax.f32 %v291_v9, %v292_v14  ;;  %v1115_v24 = vsel %vm241_vm10, %v2508_v13, 0.0 }
 0x1a0   :  { %v312_v26 = vmul.f32 1.442695, %v301_v47  ;;  %v1082_v17 = vmax.f32 %v1080_v1, %v1081_v16  ;;  %v1066_v29 = vmax.f32 %v1064_v5, %v1065_v48  ;;  %v2517_v10 = vadd.f32 %v335_v21, %v334_v11 }
 0x1a1   :  { %v1095_v30 = vmul.f32 1.442695, %v1085_v27  ;;  %v294_v2 = vrot.slane %v293_v23, 2  ;;  %v1116_v36 = vrot.slane %v1115_v24, 4  ;;  %v2523_v39 = vmax.f32 %v1052_v60, %v1053_v62 }
 0x1a2   :  { %v1016_v33 = vpop.xlane.xlu2 %1015  ;;  %v1067_v35 = vrot.slane %v1066_v29, 1  ;;  %2032 = vrcp.f32 %v2517_v10  ;;  %v2529_v47 = vmul.f32 %v2027_v20, %v2358_v7  ;;  %v1090_v1 = vsub.f32 %v2484_v53, %v1082_v17 }
 0x1a3   :  { %v2521_v34 = vsel %vm231_vm0, %v1016_v33, -1e+30  ;;  %v2029_v43 = vpop.eup %2028  ;;  %2034 = vpow2.f32 %v308_v12  ;;  %v295_v3 = vmax.f32 %v293_v23, %v294_v2  ;;  %v1117_v11 = vadd.f32 %v1116_v36, %v1115_v24 }
 0x1a4   :  { %v1069_v40 = vsel %vm241_vm10, %v2521_v34, -inf  ;;  %2036 = vpow2.f32 %v318_v22  ;;  %v1068_v5 = vmax.f32 %v1066_v29, %v1067_v35  ;;  %v2536_v12 = vmul.f32 %v2493_v15, %v2358_v7 }
 0x1a5   :  { %v1070_v55 = vrot.slane %v1069_v40, 4  ;;  %v2031_v9 = vpop.eup %2030  ;;  %2038 = vpow2.f32 %v312_v26  ;;  %v296_v14 = vrot.slane %v295_v3, 1  ;;  %vm391_vm2 = vweird.f32 %v2517_v10 }
 0x1a6   :  { %2040 = vpow2.f32 %v1095_v30  ;;  %v1088_v62 = vsub.f32 %v2497_v19, %v1068_v5  ;;  %v1118_v53 = vrot.slane %v1117_v11, 2  ;;  %v358_v48 = vsel %vm241_vm10, %v2529_v47, 0.0 }
 0x1a7   :  { %v1071_v60 = vmax.f32 %v1069_v40, %v1070_v55  ;;  %v1105_v20 = vmul.f32 1.442695, %v1090_v1  ;;  %v359_v22 = vrot.slane %v358_v48, 4  ;;  %v2543_v23 = vmul.f32 %v2029_v43, %v2403_v37 }
 0x1a8   :  { %v2033_v21 = vpop.eup %2032  ;;  %v2546_v24 = vmul.f32 %v2031_v9, %v2408_v49  ;;  %v395_v17 = vand.u32 2147483647, %v2517_v10  ;;  %v397_v29 = vand.u32 2147483648, %v2517_v10  ;;  %v297_v30 = vmax.f32 %v295_v3, %v296_v14 }
 0x1a9   :  { %v1072_v16 = vrot.slane %v1071_v60, 2  ;;  %v2035_v15 = vpop.eup %2034  ;;  %v387_v19 = vmul.f32 %v2033_v21, %v2517_v10  ;;  %v1119_v2 = vadd.f32 %v1118_v53, %v1117_v11  ;;  %v360_v36 = vadd.f32 %v359_v22, %v358_v48 }
 0x1aa   :  { %v2551_v33 = vpop.eup %2036  ;;  %v344_v35 = vsel %vm241_vm10, %v2543_v23, 0.0  ;;  %v1101_v43 = vmul.f32 1.442695, %v1088_v62  ;;  %vm392_vm3 = vweird.f32 %v2033_v21  ;;  %v365_v27 = vsel %vm241_vm10, %v2546_v24, 0.0 }
 0x1ab   :  { %v1073_v26 = vmax.f32 %v1071_v60, %v1072_v16  ;;  %v2555_v40 = vpop.eup %2038  ;;  %v388_v1 = vsub.f32 1.0, %v387_v19  ;;  %v345_v5 = vrot.slane %v344_v35, 4  ;;  %v1120_v60 = vrot.slane %v1119_v2, 1  ;;  %vm393_vm5 = vmor %vm391_vm2, %vm392_vm3 }
 0x1ac   :  { %v2041_v9 = vpop.eup %2040  ;;  %v361_v16 = vrot.slane %v360_v36, 2  ;;  %v1143_v14 = vsel %vm241_vm10, %v2536_v12, 0.0  ;;  %v305_v53 = vsub.f32 %v2503_v28, %v297_v30  ;;  %v366_v22 = vrot.slane %v365_v27, 4 }
 0x1ad   :  { %v1074_v55 = vrot.slane %v1073_v26, 1  ;;  %v389_v3 = vmul.f32 %v2033_v21, %v388_v1  ;;  %v346_v11 = vadd.f32 %v345_v5, %v344_v35  ;;  %v2562_v48 = vadd.f32 %v1120_v60, %v1119_v2 }
 0x1ae   :  { %v362_v62 = vadd.f32 %v361_v16, %v360_v36  ;;  %2042 = vpow2.f32 %v1105_v20  ;;  %vm396_vm4 = vcmp.eq.f32.partialorder %v395_v17, 8.507059e+37  ;;  %v1144_v35 = vrot.slane %v1143_v14, 4 }
 0x1af   :  { %v1075_v7 = vmax.f32 %v1073_v26, %v1074_v55  ;;  %v390_v19 = vadd.f32 %v2033_v21, %v389_v3  ;;  %v347_v8 = vrot.slane %v346_v11, 2  ;;  %v398_v26 = vor.u32 1.1754944e-38, %v397_v29 }
 0x1b0   :  { %2044 = vrcp.f32 %v2562_v48  ;;  %v2569_v55 = vmul.f32 %v2041_v9, %v2403_v37  ;;  %v363_v2 = vrot.slane %v362_v62, 1  ;;  %v320_v20 = vmul.f32 1.442695, %v305_v53 }
 0x1b1   :  { %v1089_v28 = vsub.f32 %v2521_v34, %v1075_v7  ;;  %v394_v30 = vsel %vm393_vm5, %v2033_v21, %v390_v19  ;;  %v348_v36 = vadd.f32 %v347_v8, %v346_v11  ;;  %2046 = vpow2.f32 %v1101_v43 }
 0x1b2   :  { %v399_v17 = vsel %vm396_vm4, %v398_v26, %v394_v30  ;;  %v367_v1 = vadd.f32 %v366_v22, %v365_v27  ;;  %v1180_v10 = vand.u32 2147483647, %v2562_v48  ;;  %v2574_v29 = vadd.f32 %v363_v2, %v362_v62 }
 0x1b3   :  { %v400_v5 = vmul.f32 %v399_v17, %v2472_v31  ;;  %v349_v60 = vrot.slane %v348_v36, 1  ;;  %v1182_v16 = vand.u32 2147483648, %v2562_v48  ;;  %v1145_v3 = vadd.f32 %v1144_v35, %v1143_v14 }
 0x1b4   :  { %v368_v9 = vrot.slane %v367_v1, 2  ;;  %v1129_v7 = vsel %vm241_vm10, %v2569_v55, 0.0  ;;  %v2579_v34 = vpop.eup %2042  ;;  %v3413_v8 = vsub.f32 %v2480_v54, %v2523_v39  ;;  %v1103_v31 = vmul.f32 1.442695, %v1089_v28 }
 0x1b5   :  { %508 = vperm.xlu0 %2015, %v400_v5   ;;  %2048 = vrcp.f32 %v2574_v29  ;;  %v2588_v21 = vmul.f32 %v2035_v15, %v2379_v18  ;;  %v2590_v11 = vadd.f32 %v349_v60, %v348_v36  ;;  %v1146_v53 = vrot.slane %v1145_v3, 2 }
 0x1b6   :  { %v2584_v27 = vmul.f32 1.442695, %v3413_v8  ;;  %v2045_v43 = vpop.eup %2044  ;;  %v369_v14 = vadd.f32 %v368_v9, %v367_v1  ;;  %v1130_v62 = vrot.slane %v1129_v7, 4  ;;  %2050 = vpow2.f32 %v320_v20 }
 0x1b7   :  { %v1172_v22 = vmul.f32 %v2045_v43, %v2562_v48  ;;  %vm1176_vm6 = vweird.f32 %v2562_v48  ;;  %vm2594_vm7 = vcmp.eq.f32.partialorder %v1180_v10, 8.507059e+37  ;;  %v2598_v39 = vpop.eup %2046  ;;  %v1183_v19 = vor.u32 1.1754944e-38, %v1182_v16 }
 0x1b8   :  { %v455_v15 = vand.u32 2147483647, %v2574_v29  ;;  %v457_v26 = vand.u32 2147483648, %v2574_v29  ;;  %2052 = vrcp.f32 %v2590_v11  ;;  %v370_v28 = vrot.slane %v369_v14, 1 }
 0x1b9   :  { %v1173_v35 = vsub.f32 1.0, %v1172_v22  ;;  %v1147_v30 = vadd.f32 %v1146_v53, %v1145_v3  ;;  %v1131_v2 = vadd.f32 %v1130_v62, %v1129_v7  ;;  %2054 = vpow2.f32 %v1103_v31 }
 0x1ba   :  { %vm1177_vm8 = vweird.f32 %v2045_v43  ;;  %vm451_vm2 = vweird.f32 %v2574_v29  ;;  %v337_v36 = vsel %vm241_vm10, %v2588_v21, 0.0  ;;  %v2606_v1 = vadd.f32 %v370_v28, %v369_v14 }
 0x1bb   :  { %v2049_v20 = vpop.eup %2048  ;;  %v1174_v17 = vmul.f32 %v2045_v43, %v1173_v35  ;;  %v1148_v5 = vrot.slane %v1147_v30, 1  ;;  %v1132_v10 = vrot.slane %v1131_v2, 2  ;;  %vm2609_vm3 = vcmp.eq.f32.partialorder %v455_v15, 8.507059e+37  ;;  %vm1178_vm4 = vmor %vm1176_vm6, %vm1177_vm8 }
 0x1bc   :  { %v447_v60 = vmul.f32 %v2049_v20, %v2574_v29  ;;  %v458_v9 = vor.u32 1.1754944e-38, %v457_v26  ;;  %v2615_v3 = vmul.f32 %v2551_v33, %v2440_v25  ;;  %v2617_v7 = vpop.eup %2050  ;;  %v425_v31 = vand.u32 2147483647, %v2590_v11 }
 0x1bd   :  { %v1175_v8 = vadd.f32 %v2045_v43, %v1174_v17  ;;  %v427_v14 = vand.u32 2147483648, %v2590_v11  ;;  %2056 = vrcp.f32 %v2606_v1  ;;  %v2625_v22 = vadd.f32 %v1148_v5, %v1147_v30 }
 0x1be   :  { %v2053_v53 = vpop.eup %2052  ;;  %v448_v62 = vsub.f32 1.0, %v447_v60  ;;  %v1133_v15 = vadd.f32 %v1132_v10, %v1131_v2  ;;  %v338_v33 = vrot.slane %v337_v36, 4  ;;  %vm452_vm5 = vweird.f32 %v2049_v20 }
 0x1bf   :  { %v1179_v26 = vsel %vm1178_vm4, %v2045_v43, %v1175_v8  ;;  %v417_v35 = vmul.f32 %v2053_v53, %v2590_v11  ;;  %vm421_vm1 = vweird.f32 %v2590_v11  ;;  %v2629_v28 = vpop.eup %2054  ;;  %2058 = vrcp.f32 %v2625_v22 }
 0x1c0   :  { %v1184_v17 = vsel %vm2594_vm7, %v1183_v19, %v1179_v26  ;;  %v449_v37 = vmul.f32 %v2049_v20, %v448_v62  ;;  %v372_v48 = vsel %vm241_vm10, %v2615_v3, 0.0  ;;  %vm2637_vm6 = vcmp.eq.f32.partialorder %v425_v31, 8.507059e+37  ;;  %vm453_vm7 = vmor %vm451_vm2, %vm452_vm5 }
 0x1c1   :  { %v1185_v30 = vmul.f32 %v1184_v17, %v2508_v13  ;;  %v418_v2 = vsub.f32 1.0, %v417_v35  ;;  %v428_v5 = vor.u32 1.1754944e-38, %v427_v14  ;;  %v470_v60 = vand.u32 2147483647, %v2606_v1 }
 0x1c2   :  { %v450_v10 = vadd.f32 %v2049_v20, %v449_v37  ;;  %v1134_v8 = vrot.slane %v1133_v15, 1  ;;  %v339_v54 = vadd.f32 %v338_v33, %v337_v36  ;;  %vm422_vm8 = vweird.f32 %v2053_v53 }
 0x1c3   :  { %v2057_v19 = vpop.eup %2056  ;;  %1293 = vperm.xlu0 %2015, %v1185_v30   ;;  %v419_v62 = vmul.f32 %v2053_v53, %v418_v2  ;;  %v373_v13 = vrot.slane %v372_v48, 4  ;;  %v2647_v31 = vmul.f32 %v2510_v61, %v2379_v18  ;;  %vm466_vm4 = vweird.f32 %v2606_v1  ;;  %vm423_vm2 = vmor %vm421_vm1, %vm422_vm8 }
 0x1c4   :  { %v454_v26 = vsel %vm453_vm7, %v2049_v20, %v450_v10  ;;  %v462_v37 = vmul.f32 %v2057_v19, %v2606_v1  ;;  %v472_v36 = vand.u32 2147483648, %v2606_v1  ;;  %v2654_v29 = vadd.f32 %v1134_v8, %v1133_v15 }
 0x1c5   :  { %v459_v14 = vsel %vm2609_vm3, %v458_v9, %v454_v26  ;;  %v420_v33 = vadd.f32 %v2053_v53, %v419_v62  ;;  %v340_v35 = vrot.slane %v339_v54, 2  ;;  %v2059_v17 = vpop.eup %2058  ;;  %vm2659_vm5 = vcmp.eq.f32.partialorder %v470_v60, 8.507059e+37 }
 0x1c6   :  { %v460_v30 = vmul.f32 %v459_v14, %v2529_v47  ;;  %v463_v61 = vsub.f32 1.0, %v462_v37  ;;  %v374_v2 = vadd.f32 %v373_v13, %v372_v48  ;;  %v1232_v16 = vmul.f32 %v2059_v17, %v2625_v22 }
 0x1c7   :  { %v424_v10 = vsel %vm423_vm2, %v2053_v53, %v420_v33  ;;  %2060 = vrcp.f32 %v2654_v29  ;;  %v1122_v9 = vsel %vm241_vm10, %v2647_v31, 0.0  ;;  %vm467_vm1 = vweird.f32 %v2057_v19 }
 0x1c8   :  { %528 = vperm.xlu1 %2016, %v460_v30   ;;  %v429_v47 = vsel %vm2637_vm6, %v428_v5, %v424_v10  ;;  %v464_v11 = vmul.f32 %v2057_v19, %v463_v61  ;;  %v1242_v15 = vand.u32 2147483648, %v2625_v22  ;;  %v473_v8 = vor.u32 1.1754944e-38, %v472_v36  ;;  %vm468_vm3 = vmor %vm466_vm4, %vm467_vm1 }
 0x1c9   :  { %v430_v60 = vmul.f32 %v429_v47, %v2543_v23  ;;  %v1233_v48 = vsub.f32 1.0, %v1232_v16  ;;  %v341_v53 = vadd.f32 %v340_v35, %v339_v54  ;;  %v1240_v13 = vand.u32 2147483647, %v2625_v22 }
 0x1ca   :  { %v465_v62 = vadd.f32 %v2057_v19, %v464_v11  ;;  %v375_v26 = vrot.slane %v374_v2, 2  ;;  %v1123_v37 = vrot.slane %v1122_v9, 4  ;;  %vm1237_vm6 = vweird.f32 %v2059_v17 }
 0x1cb   :  { %518 = vperm.xlu2 %2017, %v430_v60   ;;  %v1234_v43 = vmul.f32 %v2059_v17, %v1233_v48  ;;  %v342_v5 = vrot.slane %v341_v53, 1  ;;  %v2676_v14 = vmul.f32 %v2598_v39, %v2408_v49  ;;  %vm1236_vm7 = vweird.f32 %v2625_v22 }
 0x1cc   :  { %v469_v23 = vsel %vm468_vm3, %v2057_v19, %v465_v62  ;;  %v1243_v54 = vor.u32 1.1754944e-38, %v1242_v15  ;;  %v376_v36 = vadd.f32 %v375_v26, %v374_v2  ;;  %v1124_v1 = vadd.f32 %v1123_v37, %v1122_v9  ;;  %vm1238_vm8 = vmor %vm1236_vm7, %vm1237_vm6 }
 0x1cd   :  { %v2061_v33 = vpop.eup %2060  ;;  %v474_v35 = vsel %vm2659_vm5, %v473_v8, %v469_v23  ;;  %v1235_v30 = vadd.f32 %v2059_v17, %v1234_v43  ;;  %v2681_v61 = vadd.f32 %v342_v5, %v341_v53  ;;  %v1150_v19 = vsel %vm241_vm10, %v2676_v14, 0.0 }
 0x1ce   :  { %v475_v10 = vmul.f32 %v474_v35, %v2546_v24  ;;  %v1202_v16 = vmul.f32 %v2061_v33, %v2654_v29  ;;  %v377_v39 = vrot.slane %v376_v36, 1  ;;  %vm1241_vm4 = vcmp.eq.f32.partialorder %v1240_v13, 8.507059e+37 }
 0x1cf   :  { %v1239_v22 = vsel %vm1238_vm8, %v2059_v17, %v1235_v30  ;;  %v1210_v2 = vand.u32 2147483647, %v2654_v29  ;;  %2062 = vrcp.f32 %v2681_v61  ;;  %v2693_v24 = vmul.f32 %v2617_v7, %v2445_v32 }
 0x1d0   :  { %533 = vperm.xlu0 %2015, %v475_v10   ;;  %v1244_v20 = vsel %vm1241_vm4, %v1243_v54, %v1239_v22  ;;  %v1203_v47 = vsub.f32 1.0, %v1202_v16  ;;  %v2689_v11 = vadd.f32 %v377_v39, %v376_v36  ;;  %v1212_v15 = vand.u32 2147483648, %v2654_v29 }
 0x1d1   :  { %v1245_v9 = vmul.f32 %v1244_v20, %v2536_v12  ;;  %v1125_v60 = vrot.slane %v1124_v1, 2  ;;  %v1151_v17 = vrot.slane %v1150_v19, 4  ;;  %vm1207_vm2 = vweird.f32 %v2061_v33 }
 0x1d2   :  { %v1204_v8 = vmul.f32 %v2061_v33, %v1203_v47  ;;  %2064 = vrcp.f32 %v2689_v11  ;;  %vm1206_vm5 = vweird.f32 %v2654_v29  ;;  %vm1211_vm1 = vcmp.eq.f32.partialorder %v1210_v2, 8.507059e+37 }
 0x1d3   :  { %2066 = vpow2.f32 %v2584_v27  ;;  %1313 = vperm.xlu1 %2016, %v1245_v9   ;;  %v1126_v48 = vadd.f32 %v1125_v60, %v1124_v1  ;;  %v1152_v53 = vadd.f32 %v1151_v17, %v1150_v19  ;;  %v379_v12 = vsel %vm241_vm10, %v2693_v24, 0.0  ;;  %vm1208_vm3 = vmor %vm1206_vm5, %vm1207_vm2 }
 0x1d4   :  { %v1205_v62 = vadd.f32 %v2061_v33, %v1204_v8  ;;  %v2704_v7 = vmul.f32 %v2629_v28, %v2440_v25  ;;  %v1213_v26 = vor.u32 1.1754944e-38, %v1212_v15  ;;  %v412_v37 = vand.u32 2147483648, %v2681_v61 }
 0x1d5   :  { %v2063_v13 = vpop.eup %2062  ;;  %v1127_v27 = vrot.slane %v1126_v48, 1  ;;  %v1153_v43 = vrot.slane %v1152_v53, 2  ;;  %v380_v23 = vrot.slane %v379_v12, 4  ;;  %v2710_v54 = vmul.f32 %v2579_v34, %v2445_v32 }
 0x1d6   :  { %v1209_v5 = vsel %vm1208_vm3, %v2061_v33, %v1205_v62  ;;  %v402_v29 = vmul.f32 %v2063_v13, %v2681_v61  ;;  %v1157_v30 = vsel %vm241_vm10, %v2704_v7, 0.0  ;;  %vm406_vm6 = vweird.f32 %v2681_v61 }
 0x1d7   :  { %v1214_v36 = vsel %vm1211_vm1, %v1213_v26, %v1209_v5  ;;  %v2712_v35 = vadd.f32 %v1127_v27, %v1126_v48  ;;  %v1154_v28 = vadd.f32 %v1153_v43, %v1152_v53  ;;  %v381_v39 = vadd.f32 %v380_v23, %v379_v12 }
 0x1d8   :  { %v2065_v1 = vpop.eup %2064  ;;  %v1215_v10 = vmul.f32 %v1214_v36, %v2569_v55  ;;  %v403_v16 = vsub.f32 1.0, %v402_v29  ;;  %v1158_v33 = vrot.slane %v1157_v30, 4  ;;  %v410_v34 = vand.u32 2147483647, %v2681_v61 }
 0x1d9   :  { %v2717_v19 = vpop.eup %2066  ;;  %v477_v22 = vmul.f32 %v2065_v1, %v2689_v11  ;;  %2068 = vrcp.f32 %v2712_v35  ;;  %vm407_vm7 = vweird.f32 %v2063_v13  ;;  %v413_v20 = vor.u32 1.1754944e-38, %v412_v37 }
 0x1da   :  { %1303 = vperm.xlu2 %2017, %v1215_v10   ;;  %v404_v2 = vmul.f32 %v2063_v13, %v403_v16  ;;  %v1155_v47 = vrot.slane %v1154_v28, 1  ;;  %v382_v55 = vrot.slane %v381_v39, 2  ;;  %v1159_v15 = vadd.f32 %v1158_v33, %v1157_v30  ;;  %vm408_vm8 = vmor %vm406_vm6, %vm407_vm7 }
 0x1db   :  { %v478_v9 = vsub.f32 1.0, %v477_v22  ;;  %v1164_v60 = vsel %vm241_vm10, %v2710_v54, 0.0  ;;  %v485_v8 = vand.u32 2147483647, %v2689_v11  ;;  %v487_v48 = vand.u32 2147483648, %v2689_v11 }
 0x1dc   :  { %v405_v17 = vadd.f32 %v2063_v13, %v404_v2  ;;  %v2727_v53 = vadd.f32 %v1155_v47, %v1154_v28  ;;  %vm482_vm4 = vweird.f32 %v2065_v1  ;;  %v383_v12 = vadd.f32 %v382_v55, %v381_v39 }
 0x1dd   :  { %v479_v62 = vmul.f32 %v2065_v1, %v478_v9  ;;  %v1160_v26 = vrot.slane %v1159_v15, 2  ;;  %vm411_vm2 = vcmp.eq.f32.partialorder %v410_v34, 8.507059e+37  ;;  %v1165_v27 = vrot.slane %v1164_v60, 4 }
 0x1de   :  { %v409_v37 = vsel %vm408_vm8, %v2063_v13, %v405_v17  ;;  %2070 = vrcp.f32 %v2727_v53  ;;  %vm481_vm5 = vweird.f32 %v2689_v11  ;;  %v384_v23 = vrot.slane %v383_v12, 1 }
 0x1df   :  { %v2069_v43 = vpop.eup %2068  ;;  %v414_v5 = vsel %vm411_vm2, %v413_v20, %v409_v37  ;;  %v480_v29 = vadd.f32 %v2065_v1, %v479_v62  ;;  %vm483_vm1 = vmor %vm481_vm5, %vm482_vm4  ;;  %vm486_vm3 = vcmp.eq.f32.partialorder %v485_v8, 8.507059e+37  ;;  %v488_v61 = vor.u32 1.1754944e-38, %v487_v48 }
 0x1e0   :  { %v415_v36 = vmul.f32 %v414_v5, %v2588_v21  ;;  %v1187_v28 = vmul.f32 %v2069_v43, %v2712_v35  ;;  %v1195_v13 = vand.u32 2147483647, %v2712_v35  ;;  %v2736_v10 = vadd.f32 %v384_v23, %v383_v12 }
 0x1e1   :  { %v484_v30 = vsel %vm483_vm1, %v2065_v1, %v480_v29  ;;  %v1161_v16 = vadd.f32 %v1160_v26, %v1159_v15  ;;  %v1166_v34 = vadd.f32 %v1165_v27, %v1164_v60  ;;  %v2740_v11 = vmul.f32 %v2555_v40, %v2419_v6 }
 0x1e2   :  { %513 = vperm.xlu1 %2016, %v415_v36   ;;  %v489_v39 = vsel %vm486_vm3, %v488_v61, %v484_v30  ;;  %v1188_v33 = vsub.f32 1.0, %v1187_v28  ;;  %v1197_v22 = vand.u32 2147483648, %v2712_v35  ;;  %2072 = vrcp.f32 %v2736_v10 }
 0x1e3   :  { %v490_v21 = vmul.f32 %v489_v39, %v2615_v3  ;;  %vm1192_vm6 = vweird.f32 %v2069_v43  ;;  %v1162_v20 = vrot.slane %v1161_v16, 1  ;;  %v1167_v47 = vrot.slane %v1166_v34, 2 }
 0x1e4   :  { %v2071_v1 = vpop.eup %2070  ;;  %v1189_v2 = vmul.f32 %v2069_v43, %v1188_v33  ;;  %vm1191_vm7 = vweird.f32 %v2712_v35  ;;  %v351_v40 = vsel %vm241_vm10, %v2740_v11, 0.0  ;;  %vm1196_vm8 = vcmp.eq.f32.partialorder %v1195_v13, 8.507059e+37 }
 0x1e5   :  { %538 = vperm.xlu2 %2017, %v490_v21   ;;  %v1247_v9 = vmul.f32 %v2071_v1, %v2727_v53  ;;  %v2749_v3 = vadd.f32 %v1162_v20, %v1161_v16  ;;  %v1168_v15 = vadd.f32 %v1167_v47, %v1166_v34  ;;  %vm1193_vm4 = vmor %vm1191_vm7, %vm1192_vm6  ;;  %v1198_v60 = vor.u32 1.1754944e-38, %v1197_v22 }
 0x1e6   :  { %v1190_v55 = vadd.f32 %v2069_v43, %v1189_v2  ;;  %v1255_v8 = vand.u32 2147483647, %v2727_v53  ;;  %v352_v48 = vrot.slane %v351_v40, 4  ;;  %vm1252_vm2 = vweird.f32 %v2071_v1 }
 0x1e7   :  { %v1248_v17 = vsub.f32 1.0, %v1247_v9  ;;  %v1257_v35 = vand.u32 2147483648, %v2727_v53  ;;  %2074 = vrcp.f32 %v2749_v3  ;;  %v1169_v27 = vrot.slane %v1168_v15, 1 }
 0x1e8   :  { %v1194_v62 = vsel %vm1193_vm4, %v2069_v43, %v1190_v55  ;;  %v2073_v12 = vpop.eup %2072  ;;  %v2756_v5 = vmul.f32 %v2717_v19, %v2419_v6  ;;  %vm1251_vm5 = vweird.f32 %v2727_v53  ;;  %v353_v61 = vadd.f32 %v352_v48, %v351_v40 }
 0x1e9   :  { %v1199_v26 = vsel %vm1196_vm8, %v1198_v60, %v1194_v62  ;;  %v1249_v37 = vmul.f32 %v2071_v1, %v1248_v17  ;;  %v492_v23 = vmul.f32 %v2073_v12, %v2736_v10  ;;  %v2761_v43 = vadd.f32 %v1169_v27, %v1168_v15  ;;  %vm1253_vm1 = vmor %vm1251_vm5, %vm1252_vm2 }
 0x1ea   :  { %v1200_v29 = vmul.f32 %v1199_v26, %v2647_v31  ;;  %vm1256_vm3 = vcmp.eq.f32.partialorder %v1255_v8, 8.507059e+37  ;;  %v1258_v28 = vor.u32 1.1754944e-38, %v1257_v35  ;;  %v500_v13 = vand.u32 2147483647, %v2736_v10 }
 0x1eb   :  { %v1250_v36 = vadd.f32 %v2071_v1, %v1249_v37  ;;  %v493_v30 = vsub.f32 1.0, %v492_v23  ;;  %v502_v16 = vand.u32 2147483648, %v2736_v10  ;;  %2076 = vrcp.f32 %v2761_v43 }
 0x1ec   :  { %1298 = vperm.xlu1 %2016, %v1200_v29   ;;  %v1136_v31 = vsel %vm241_vm10, %v2756_v5, 0.0  ;;  %vm497_vm6 = vweird.f32 %v2073_v12  ;;  %v354_v34 = vrot.slane %v353_v61, 2  ;;  %vm496_vm7 = vweird.f32 %v2736_v10 }
 0x1ed   :  { %v1254_v19 = vsel %vm1253_vm1, %v2071_v1, %v1250_v36  ;;  %v2075_v53 = vpop.eup %2074  ;;  %v494_v33 = vmul.f32 %v2073_v12, %v493_v30  ;;  %v1137_v20 = vrot.slane %v1136_v31, 4  ;;  %vm498_vm8 = vmor %vm496_vm7, %vm497_vm6  ;;  %vm501_vm4 = vcmp.eq.f32.partialorder %v500_v13, 8.507059e+37 }
 0x1ee   :  { %v1259_v39 = vsel %vm1256_vm3, %v1258_v28, %v1254_v19  ;;  %v1262_v22 = vmul.f32 %v2075_v53, %v2749_v3  ;;  %v355_v1 = vadd.f32 %v354_v34, %v353_v61  ;;  %v503_v47 = vor.u32 1.1754944e-38, %v502_v16 }
 0x1ef   :  { %v1260_v21 = vmul.f32 %v1259_v39, %v2676_v14  ;;  %v495_v2 = vadd.f32 %v2073_v12, %v494_v33  ;;  %v1272_v55 = vand.u32 2147483648, %v2749_v3  ;;  %v1138_v60 = vadd.f32 %v1137_v20, %v1136_v31 }
 0x1f0   :  { %v1263_v9 = vsub.f32 1.0, %v1262_v22  ;;  %v356_v15 = vrot.slane %v355_v1, 1  ;;  %vm1267_vm2 = vweird.f32 %v2075_v53  ;;  %v1270_v48 = vand.u32 2147483647, %v2749_v3 }
 0x1f1   :  { %1318 = vperm.xlu2 %2017, %v1260_v21   ;;  %v499_v40 = vsel %vm498_vm8, %v2073_v12, %v495_v2  ;;  %v2077_v17 = vpop.eup %2076  ;;  %vm1266_vm5 = vweird.f32 %v2749_v3  ;;  %v1139_v37 = vrot.slane %v1138_v60, 2  ;;  %v1273_v12 = vor.u32 1.1754944e-38, %v1272_v55 }
 0x1f2   :  { %v504_v8 = vsel %vm501_vm4, %v503_v47, %v499_v40  ;;  %v1264_v14 = vmul.f32 %v2075_v53, %v1263_v9  ;;  %v1277_v62 = vmul.f32 %v2077_v17, %v2761_v43  ;;  %v357_v35 = vadd.f32 %v356_v15, %v355_v1  ;;  %vm1268_vm1 = vmor %vm1266_vm5, %vm1267_vm2 }
 0x1f3   :  { %v505_v10 = vmul.f32 %v504_v8, %v2693_v24  ;;  %vm1271_vm3 = vcmp.eq.f32.partialorder %v1270_v48, 8.507059e+37  ;;  %v1287_v23 = vand.u32 2147483648, %v2761_v43  ;;  %v1140_v36 = vadd.f32 %v1139_v37, %v1138_v60 }
 0x1f4   :  { %v1265_v26 = vadd.f32 %v2075_v53, %v1264_v14  ;;  %v1278_v27 = vsub.f32 1.0, %v1277_v62  ;;  %2078 = vrcp.f32 %v357_v35  ;;  %vm1282_vm6 = vweird.f32 %v2077_v17 }
 0x1f5   :  { %543 = vperm.xlu1 %2016, %v505_v10   ;;  %v1285_v24 = vand.u32 2147483647, %v2761_v43  ;;  %v1141_v13 = vrot.slane %v1140_v36, 1  ;;  %vm1281_vm7 = vweird.f32 %v2761_v43  ;;  %v1288_v19 = vor.u32 1.1754944e-38, %v1287_v23 }
 0x1f6   :  { %v1269_v29 = vsel %vm1268_vm1, %v2075_v53, %v1265_v26  ;;  %v1279_v28 = vmul.f32 %v2077_v17, %v1278_v27  ;;  %vm1283_vm8 = vmor %vm1281_vm7, %vm1282_vm6  ;;  %v442_v22 = vand.u32 2147483648, %v357_v35  ;;  %v440_v2 = vand.u32 2147483647, %v357_v35 }
 0x1f7   :  { %v1274_v61 = vsel %vm1271_vm3, %v1273_v12, %v1269_v29  ;;  %v1142_v16 = vadd.f32 %v1141_v13, %v1140_v36  ;;  %vm1286_vm4 = vcmp.eq.f32.partialorder %v1285_v24, 8.507059e+37  ;;  %vm436_vm5 = vweird.f32 %v357_v35 }
 0x1f8   :  { %v1275_v30 = vmul.f32 %v1274_v61, %v2704_v7  ;;  %v1280_v3 = vadd.f32 %v2077_v17, %v1279_v28  ;;  %v443_v20 = vor.u32 1.1754944e-38, %v442_v22  ;;  %vm441_vm3 = vcmp.eq.f32.partialorder %v440_v2, 8.507059e+37 }
 0x1f9   :  { %2080 = vrcp.f32 %v1142_v16  ;;  %v1227_v60 = vand.u32 2147483648, %v1142_v16  ;;  %vm1221_vm7 = vweird.f32 %v1142_v16 }
 0x1fa   :  { %1323 = vperm.xlu0 %2015, %v1275_v30   ;;  %v2079_v31 = vpop.eup %2078  ;;  %v1284_v53 = vsel %vm1283_vm8, %v2077_v17, %v1280_v3  ;;  %v1225_v17 = vand.u32 2147483647, %v1142_v16 }
 0x1fb   :  { %v1289_v39 = vsel %vm1286_vm4, %v1288_v19, %v1284_v53  ;;  %v432_v33 = vmul.f32 %v2079_v31, %v357_v35  ;;  %vm437_vm2 = vweird.f32 %v2079_v31  ;;  %v1228_v14 = vor.u32 1.1754944e-38, %v1227_v60 }
 0x1fc   :  { %v1290_v34 = vmul.f32 %v1289_v39, %v2710_v54  ;;  %vm438_vm1 = vmor %vm436_vm5, %vm437_vm2  ;;  %vm1226_vm4 = vcmp.eq.f32.partialorder %v1225_v17, 8.507059e+37 }
 0x1fd   :  { %v433_v21 = vsub.f32 1.0, %v432_v33 }
 0x1fe   :  { %1328 = vperm.xlu1 %2016, %v1290_v34  }
 0x1ff   :  { %v434_v7 = vmul.f32 %v2079_v31, %v433_v21  ;;  %v2081_v1 = vpop.eup %2080 }
 0x200   :  { %v1217_v47 = vmul.f32 %v2081_v1, %v1142_v16  ;;  %vm1222_vm6 = vweird.f32 %v2081_v1 }
 0x201   :  { %v435_v43 = vadd.f32 %v2079_v31, %v434_v7  ;;  %vm1223_vm8 = vmor %vm1221_vm7, %vm1222_vm6 }
 0x202   :  { %v1218_v55 = vsub.f32 1.0, %v1217_v47 }
 0x203   :  { %v439_v9 = vsel %vm438_vm1, %v2079_v31, %v435_v43 }
 0x204   :  { %v444_v40 = vsel %vm441_vm3, %v443_v20, %v439_v9  ;;  %v1219_v54 = vmul.f32 %v2081_v1, %v1218_v55  ;;  %vm3429_vm3 = vcmp.gt.f32.partialorder %v2445_v32, 0.0 }
 0x205   :  { %v445_v15 = vmul.f32 %v444_v40, %v2740_v11  ;;  %vm3430_vm7 = vmmov %vm3429_vm3 }
 0x206   :  { %v1220_v8 = vadd.f32 %v2081_v1, %v1219_v54 }
 0x207   :  { %523 = vperm.xlu0 %2015, %v445_v15  }
 0x208   :  { %v1224_v48 = vsel %vm1223_vm8, %v2081_v1, %v1220_v8 }
 0x209   :  { %v1229_v10 = vsel %vm1226_vm4, %v1228_v14, %v1224_v48 }
 0x20a   :  { %v1230_v62 = vmul.f32 %v1229_v10, %v2756_v5 }
 0x20f   :  { %1308 = vperm.xlu0 %2015, %v1230_v62  }
 0x225   :  { %v519_v12 = vpop.permute.xlu2 %518 }
 0x226   :  { %v548_v31 = vmul.f32 %v519_v12, %v2328_v52 }
 0x227   :  { %v509_v35 = vpop.permute.xlu0 %508 }
 0x228   :  { %v546_v26 = vmul.f32 %v509_v35, %v2310_v41  ;;  %v566_v21 = vrot.slane %v548_v31, 4 }
 0x22a   :  { %v554_v37 = vrot.slane %v546_v26, 4  ;;  %v567_v9 = vadd.f32 %v566_v21, %v548_v31 }
 0x22c   :  { %v555_v11 = vadd.f32 %v554_v37, %v546_v26  ;;  %v568_v48 = vrot.slane %v567_v9, 2 }
 0x22e   :  { %v556_v27 = vrot.slane %v555_v11, 2 }
 0x230   :  { %v557_v29 = vadd.f32 %v556_v27, %v555_v11  ;;  %v569_v27 = vadd.f32 %v568_v48, %v567_v9 }
 0x232   :  { %v558_v23 = vrot.slane %v557_v29, 1 }
 0x234   :  { %v559_v28 = vadd.f32 %v558_v23, %v557_v29  ;;  %v1304_v24 = vpop.permute.xlu2 %1303 }
 0x235   :  { %v1294_v36 = vpop.permute.xlu0 %1293  ;;  %v1333_v40 = vmul.f32 %v1304_v24, %v2333_v56 }
 0x236   :  { %v1331_v61 = vmul.f32 %v1294_v36, %v2312_v42  ;;  %v602_v13 = vmul.f32 %v559_v28, %v2310_v41 }
 0x237   :  { %v1351_v10 = vrot.slane %v1333_v40, 4 }
 0x238   :  { %v1339_v30 = vrot.slane %v1331_v61, 4 }
 0x239   :  { %610 = vadd.xlane.f32.xlu0 %v602_v13  ;;  %v1352_v29 = vadd.f32 %v1351_v10, %v1333_v40 }
 0x23a   :  { %v1340_v3 = vadd.f32 %v1339_v30, %v1331_v61  ;;  %v529_v5 = vpop.permute.xlu1 %528 }
 0x23b   :  { %v550_v19 = vmul.f32 %v529_v5, %v2315_v44  ;;  %v1353_v30 = vrot.slane %v1352_v29, 2  ;;  %v570_v5 = vrot.slane %v569_v27, 1 }
 0x23c   :  { %v1341_v16 = vrot.slane %v1340_v3, 2 }
 0x23d   :  { %v578_v53 = vrot.slane %v550_v19, 4 }
 0x23e   :  { %v1342_v39 = vadd.f32 %v1341_v16, %v1340_v3 }
 0x23f   :  { %v579_v33 = vadd.f32 %v578_v53, %v550_v19  ;;  %v539_v22 = vpop.permute.xlu2 %538  ;;  %v1354_v53 = vadd.f32 %v1353_v30, %v1352_v29 }
 0x240   :  { %v1343_v34 = vrot.slane %v1342_v39, 1 }
 0x241   :  { %v580_v7 = vrot.slane %v579_v33, 2 }
 0x242   :  { %v534_v2 = vpop.permute.xlu0 %533  ;;  %v1344_v1 = vadd.f32 %v1343_v34, %v1342_v39  ;;  %v571_v34 = vadd.f32 %v570_v5, %v569_v27 }
 0x243   :  { %v581_v43 = vadd.f32 %v580_v7, %v579_v33  ;;  %v551_v20 = vmul.f32 %v534_v2, %v2326_v51  ;;  %v552_v7 = vmul.f32 %v539_v22, %v2337_v58 }
 0x244   :  { %v1387_v47 = vmul.f32 %v1344_v1, %v2312_v42 }
 0x245   :  { %v584_v55 = vrot.slane %v551_v20, 4  ;;  %v1314_v15 = vpop.permute.xlu1 %1313  ;;  %v582_v60 = vrot.slane %v581_v43, 1  ;;  %v590_v9 = vrot.slane %v552_v7, 4 }
 0x246   :  { %v1335_v54 = vmul.f32 %v1314_v15, %v2307_v38  ;;  %1395 = vadd.xlane.f32.xlu0 %v1387_v47 }
 0x247   :  { %v585_v17 = vadd.f32 %v584_v55, %v551_v20  ;;  %v583_v8 = vadd.f32 %v582_v60, %v581_v43  ;;  %v604_v43 = vmul.f32 %v571_v34, %v2328_v52  ;;  %v1355_v20 = vrot.slane %v1354_v53, 1 }
 0x248   :  { %v1363_v14 = vrot.slane %v1335_v54, 4 }
 0x249   :  { %v586_v62 = vrot.slane %v585_v17, 2  ;;  %v606_v26 = vmul.f32 %v583_v8, %v2315_v44  ;;  %v1356_v15 = vadd.f32 %v1355_v20, %v1354_v53  ;;  %v591_v8 = vadd.f32 %v590_v9, %v552_v7 }
 0x24a   :  { %v1364_v35 = vadd.f32 %v1363_v14, %v1335_v54 }
 0x24b   :  { %v1319_v37 = vpop.permute.xlu2 %1318  ;;  %v587_v11 = vadd.f32 %v586_v62, %v585_v17  ;;  %v1389_v22 = vmul.f32 %v1356_v15, %v2333_v56 }
 0x24c   :  { %v1365_v12 = vrot.slane %v1364_v35, 2  ;;  %v1336_v23 = vmul.f32 %v1319_v37, %v2324_v50 }
 0x24d   :  { %v588_v36 = vrot.slane %v587_v11, 1 }
 0x24e   :  { %v1366_v61 = vadd.f32 %v1365_v12, %v1364_v35  ;;  %618 = vadd.xlane.f32.xlu0 %v606_v26  ;;  %v1369_v13 = vrot.slane %v1336_v23, 4  ;;  %v592_v26 = vrot.slane %v591_v8, 2 }
 0x24f   :  { %v589_v28 = vadd.f32 %v588_v36, %v587_v11 }
 0x250   :  { %v1367_v24 = vrot.slane %v1366_v61, 1  ;;  %v1370_v39 = vadd.f32 %v1369_v13, %v1336_v23  ;;  %v593_v27 = vadd.f32 %v592_v26, %v591_v8 }
 0x251   :  { %v607_v3 = vmul.f32 %v589_v28, %v2326_v51 }
 0x252   :  { %v1368_v19 = vadd.f32 %v1367_v24, %v1366_v61  ;;  %v1371_v2 = vrot.slane %v1370_v39, 2  ;;  %v594_v24 = vrot.slane %v593_v27, 1 }
 0x253   :  { %620 = vadd.xlane.f32.xlu2 %v607_v3 }
 0x254   :  { %v514_v16 = vpop.permute.xlu1 %513  ;;  %v1391_v31 = vmul.f32 %v1368_v19, %v2307_v38  ;;  %v1372_v40 = vadd.f32 %v1371_v2, %v1370_v39  ;;  %v595_v13 = vadd.f32 %v594_v24, %v593_v27 }
 0x255   :  { %v547_v33 = vmul.f32 %v514_v16, %v2317_v45 }
 0x256   :  { %1403 = vadd.xlane.f32.xlu1 %v1391_v31  ;;  %v1373_v10 = vrot.slane %v1372_v40, 1  ;;  %v608_v5 = vmul.f32 %v595_v13, %v2337_v58 }
 0x257   :  { %v560_v21 = vrot.slane %v547_v33, 4 }
 0x258   :  { %v1374_v11 = vadd.f32 %v1373_v10, %v1372_v40 }
 0x259   :  { %v561_v1 = vadd.f32 %v560_v21, %v547_v33 }
 0x25a   :  { %v1392_v36 = vmul.f32 %v1374_v11, %v2324_v50 }
 0x25b   :  { %v562_v47 = vrot.slane %v561_v1, 2  ;;  %614 = vadd.xlane.f32.xlu2 %v604_v43 }
 0x25d   :  { %v563_v55 = vadd.f32 %v562_v47, %v561_v1 }
 0x25e   :  { %v1299_v60 = vpop.permute.xlu1 %1298 }
 0x25f   :  { %v1332_v54 = vmul.f32 %v1299_v60, %v2319_v46  ;;  %v564_v17 = vrot.slane %v563_v55, 1 }
 0x261   :  { %v1345_v14 = vrot.slane %v1332_v54, 4  ;;  %v565_v48 = vadd.f32 %v564_v17, %v563_v55 }
 0x263   :  { %v1346_v62 = vadd.f32 %v1345_v14, %v1332_v54  ;;  %v603_v35 = vmul.f32 %v565_v48, %v2317_v45  ;;  %1399 = vadd.xlane.f32.xlu2 %v1389_v22 }
 0x265   :  { %v1347_v37 = vrot.slane %v1346_v62, 2  ;;  %612 = vadd.xlane.f32.xlu0 %v603_v35 }
 0x267   :  { %v1348_v12 = vadd.f32 %v1347_v37, %v1346_v62  ;;  %v544_v29 = vpop.permute.xlu1 %543 }
 0x268   :  { %v553_v39 = vmul.f32 %v544_v29, %v2351_v4 }
 0x269   :  { %v1349_v23 = vrot.slane %v1348_v12, 1 }
 0x26a   :  { %v596_v7 = vrot.slane %v553_v39, 4 }
 0x26b   :  { %v1350_v61 = vadd.f32 %v1349_v23, %v1348_v12  ;;  %1405 = vadd.xlane.f32.xlu2 %v1392_v36 }
 0x26c   :  { %v1324_v30 = vpop.permute.xlu0 %1323  ;;  %v597_v9 = vadd.f32 %v596_v7, %v553_v39 }
 0x26d   :  { %v1388_v28 = vmul.f32 %v1350_v61, %v2319_v46  ;;  %v1337_v40 = vmul.f32 %v1324_v30, %v2335_v57 }
 0x26e   :  { %v598_v8 = vrot.slane %v597_v9, 2 }
 0x26f   :  { %1397 = vadd.xlane.f32.xlu1 %v1388_v28  ;;  %v1375_v14 = vrot.slane %v1337_v40, 4 }
 0x270   :  { %v1329_v3 = vpop.permute.xlu1 %1328  ;;  %v599_v35 = vadd.f32 %v598_v8, %v597_v9 }
 0x271   :  { %v1338_v19 = vmul.f32 %v1329_v3, %v2346_v0  ;;  %v1376_v26 = vadd.f32 %v1375_v14, %v1337_v40 }
 0x272   :  { %v600_v36 = vrot.slane %v599_v35, 1 }
 0x273   :  { %v1381_v16 = vrot.slane %v1338_v19, 4  ;;  %v1377_v27 = vrot.slane %v1376_v26, 2 }
 0x274   :  { %v601_v28 = vadd.f32 %v600_v36, %v599_v35 }
 0x275   :  { %v1382_v33 = vadd.f32 %v1381_v16, %v1338_v19  ;;  %v1378_v61 = vadd.f32 %v1377_v27, %v1376_v26 }
 0x276   :  { %v609_v24 = vmul.f32 %v601_v28, %v2351_v4 }
 0x277   :  { %622 = vadd.xlane.f32.xlu1 %v608_v5  ;;  %v1383_v2 = vrot.slane %v1382_v33, 2  ;;  %v1379_v30 = vrot.slane %v1378_v61, 1 }
 0x279   :  { %v524_v31 = vpop.permute.xlu0 %523  ;;  %v1384_v55 = vadd.f32 %v1383_v2, %v1382_v33  ;;  %v1380_v13 = vadd.f32 %v1379_v30, %v1378_v61 }
 0x27a   :  { %v549_v53 = vmul.f32 %v524_v31, %v2339_v59 }
 0x27b   :  { %v1385_v10 = vrot.slane %v1384_v55, 1  ;;  %v1393_v3 = vmul.f32 %v1380_v13, %v2335_v57 }
 0x27c   :  { %v572_v34 = vrot.slane %v549_v53, 4 }
 0x27d   :  { %v1386_v37 = vadd.f32 %v1385_v10, %v1384_v55 }
 0x27e   :  { %v573_v21 = vadd.f32 %v572_v34, %v549_v53 }
 0x27f   :  { %v1394_v29 = vmul.f32 %v1386_v37, %v2346_v0 }
 0x280   :  { %v574_v1 = vrot.slane %v573_v21, 2 }
 0x281   :  { %v1309_v43 = vpop.permute.xlu0 %1308 }
 0x282   :  { %v575_v20 = vadd.f32 %v574_v1, %v573_v21  ;;  %v1334_v47 = vmul.f32 %v1309_v43, %v2344_v63 }
 0x284   :  { %v1357_v15 = vrot.slane %v1334_v47, 4  ;;  %v576_v60 = vrot.slane %v575_v20, 1 }
 0x286   :  { %v1358_v54 = vadd.f32 %v1357_v15, %v1334_v47  ;;  %v577_v17 = vadd.f32 %v576_v60, %v575_v20 }
 0x288   :  { %v1359_v48 = vrot.slane %v1358_v54, 2  ;;  %v605_v22 = vmul.f32 %v577_v17, %v2339_v59 }
 0x28a   :  { %v1360_v62 = vadd.f32 %v1359_v48, %v1358_v54  ;;  %616 = vadd.xlane.f32.xlu1 %v605_v22 }
 0x28c   :  { %v1361_v11 = vrot.slane %v1360_v62, 1 }
 0x28e   :  { %v1362_v12 = vadd.f32 %v1361_v11, %v1360_v62 }
 0x290   :  { %v1390_v23 = vmul.f32 %v1362_v12, %v2344_v63 }
 0x292   :  { %1409 = vadd.xlane.f32.xlu1 %v1394_v29  ;;  %1401 = vadd.xlane.f32.xlu0 %v1390_v23 }
 0x29a   :  { %624 = vadd.xlane.f32.xlu0 %v609_v24 }
 0x2a2   :  { %1407 = vadd.xlane.f32.xlu0 %v1393_v3 }
 0x2ac   :  { %v611_v5 = vpop.xlane.xlu0 %610 }
 0x2ad   :  { %v626_v16 = vsel %vm225_vm11, %v611_v5, -1e+30 }
 0x2ae   :  { %v634_v31 = vsel %vm241_vm10, %v626_v16, -inf }
 0x2af   :  { %v635_v53 = vrot.slane %v634_v31, 4 }
 0x2b1   :  { %v636_v34 = vmax.f32 %v634_v31, %v635_v53 }
 0x2b3   :  { %v637_v7 = vrot.slane %v636_v34, 2 }
 0x2b5   :  { %v638_v47 = vmax.f32 %v636_v34, %v637_v7 }
 0x2b7   :  { %v639_v60 = vrot.slane %v638_v47, 1 }
 0x2b9   :  { %v1396_v39 = vpop.xlane.xlu0 %1395  ;;  %v640_v10 = vmax.f32 %v638_v47, %v639_v60 }
 0x2ba   :  { %v1411_v33 = vsel %vm225_vm11, %v1396_v39, -1e+30 }
 0x2bb   :  { %v1419_v21 = vsel %vm241_vm10, %v1411_v33, -inf  ;;  %v690_v12 = vsub.f32 %v626_v16, %v640_v10 }
 0x2bc   :  { %v1420_v2 = vrot.slane %v1419_v21, 4 }
 0x2bd   :  { %v698_v24 = vmul.f32 1.442695, %v690_v12 }
 0x2be   :  { %v1421_v9 = vmax.f32 %v1419_v21, %v1420_v2 }
 0x2bf   :  { %2082 = vpow2.f32 %v698_v24 }
 0x2c0   :  { %v1422_v17 = vrot.slane %v1421_v9, 2 }
 0x2c1   :  { %v619_v1 = vpop.xlane.xlu0 %618 }
 0x2c2   :  { %v2824_v20 = vsel %vm229_vm9, %v619_v1, -1e+30  ;;  %v1423_v62 = vmax.f32 %v1421_v9, %v1422_v17 }
 0x2c3   :  { %v662_v55 = vsel %vm241_vm10, %v2824_v20, -inf }
 0x2c4   :  { %v663_v8 = vrot.slane %v662_v55, 4  ;;  %v1424_v27 = vrot.slane %v1423_v62, 1 }
 0x2c6   :  { %v621_v40 = vpop.xlane.xlu2 %620  ;;  %v664_v35 = vmax.f32 %v662_v55, %v663_v8  ;;  %v1425_v13 = vmax.f32 %v1423_v62, %v1424_v27  ;;  %v2083_v8 = vpop.eup %2082 }
 0x2c7   :  { %v2830_v15 = vsel %vm230_vm14, %v621_v40, -1e+30 }
 0x2c8   :  { %v669_v54 = vsel %vm241_vm10, %v2830_v15, -inf  ;;  %v665_v29 = vrot.slane %v664_v35, 2  ;;  %v1475_v21 = vsub.f32 %v1411_v33, %v1425_v13 }
 0x2c9   :  { %v1404_v14 = vpop.xlane.xlu1 %1403  ;;  %v670_v48 = vrot.slane %v669_v54, 4 }
 0x2ca   :  { %v2836_v22 = vsel %vm229_vm9, %v1404_v14, -1e+30  ;;  %v666_v3 = vmax.f32 %v664_v35, %v665_v29  ;;  %v1483_v60 = vmul.f32 1.442695, %v1475_v21 }
 0x2cb   :  { %v671_v26 = vmax.f32 %v669_v54, %v670_v48  ;;  %v1447_v37 = vsel %vm241_vm10, %v2836_v22, -inf }
 0x2cc   :  { %v1448_v23 = vrot.slane %v1447_v37, 4  ;;  %v667_v7 = vrot.slane %v666_v3, 1  ;;  %2084 = vpow2.f32 %v1483_v60 }
 0x2cd   :  { %v672_v28 = vrot.slane %v671_v26, 2 }
 0x2ce   :  { %v615_v11 = vpop.xlane.xlu2 %614  ;;  %v1449_v5 = vmax.f32 %v1447_v37, %v1448_v23  ;;  %v668_v54 = vmax.f32 %v666_v3, %v667_v7  ;;  %v2178_v23 = vld [vmem:[%s3387_s1] sm:$0xff] }
 0x2cf   :  { %v2842_v61 = vsel %vm227_vm13, %v615_v11, -1e+30  ;;  %v673_v19 = vmax.f32 %v671_v26, %v672_v28  ;;  %v2869_v36 = vmul.f32 %v2178_v23, %v2083_v8 }
 0x2d0   :  { %v648_v30 = vsel %vm241_vm10, %v2842_v61, -inf  ;;  %v1450_v2 = vrot.slane %v1449_v5, 2  ;;  %v694_v26 = vsub.f32 %v2824_v20, %v668_v54 }
 0x2d1   :  { %v649_v53 = vrot.slane %v648_v30, 4  ;;  %v674_v43 = vrot.slane %v673_v19, 1 }
 0x2d2   :  { %v1451_v17 = vmax.f32 %v1449_v5, %v1450_v2  ;;  %v706_v13 = vmul.f32 1.442695, %v694_v26 }
 0x2d3   :  { %v650_v9 = vmax.f32 %v648_v30, %v649_v53  ;;  %v675_v14 = vmax.f32 %v673_v19, %v674_v43 }
 0x2d4   :  { %v1452_v37 = vrot.slane %v1451_v17, 1  ;;  %2086 = vpow2.f32 %v706_v13 }
 0x2d5   :  { %v651_v10 = vrot.slane %v650_v9, 2  ;;  %v695_v12 = vsub.f32 %v2830_v15, %v675_v14  ;;  %v722_v15 = vsel %vm241_vm10, %v2869_v36, 0.0 }
 0x2d6   :  { %v1400_v31 = vpop.xlane.xlu2 %1399  ;;  %v1453_v3 = vmax.f32 %v1451_v17, %v1452_v37  ;;  %v723_v53 = vrot.slane %v722_v15, 4 }
 0x2d7   :  { %v2848_v16 = vsel %vm227_vm13, %v1400_v31, -1e+30  ;;  %v652_v49 = vmax.f32 %v650_v9, %v651_v10  ;;  %v708_v19 = vmul.f32 1.442695, %v695_v12 }
 0x2d8   :  { %v1433_v39 = vsel %vm241_vm10, %v2848_v16, -inf  ;;  %v613_v34 = vpop.xlane.xlu0 %612  ;;  %v724_v2 = vadd.f32 %v723_v53, %v722_v15  ;;  %v1479_v43 = vsub.f32 %v2836_v22, %v1453_v3 }
 0x2d9   :  { %v2854_v1 = vsel %vm226_vm12, %v613_v34, -1e+30  ;;  %v1434_v40 = vrot.slane %v1433_v39, 4  ;;  %v653_v34 = vrot.slane %v652_v49, 1  ;;  %2088 = vpow2.f32 %v708_v19 }
 0x2da   :  { %v641_v47 = vsel %vm241_vm10, %v2854_v1, -inf }
 0x2db   :  { %v642_v55 = vrot.slane %v641_v47, 4  ;;  %v1435_v62 = vmax.f32 %v1433_v39, %v1434_v40  ;;  %v2085_v39 = vpop.eup %2084  ;;  %v654_v54 = vmax.f32 %v652_v49, %v653_v34  ;;  %v2896_v49 = vld [vmem:[%s3387_s1 + $0x10] sm:$0xff] }
 0x2dc   :  { %v2880_v60 = vmul.f32 %v2178_v23, %v2085_v39 }
 0x2dd   :  { %v643_v48 = vmax.f32 %v641_v47, %v642_v55  ;;  %v1436_v28 = vrot.slane %v1435_v62, 2  ;;  %v725_v55 = vrot.slane %v724_v2, 2 }
 0x2de   :  { %v1406_v33 = vpop.xlane.xlu2 %1405  ;;  %v1507_v22 = vsel %vm241_vm10, %v2880_v60, 0.0 }
 0x2df   :  { %v2860_v35 = vsel %vm230_vm14, %v1406_v33, -1e+30  ;;  %v644_v27 = vrot.slane %v643_v48, 2  ;;  %v1437_v21 = vmax.f32 %v1435_v62, %v1436_v28  ;;  %v726_v10 = vadd.f32 %v725_v55, %v724_v2 }
 0x2e0   :  { %v1454_v11 = vsel %vm241_vm10, %v2860_v35, -inf  ;;  %v1491_v62 = vmul.f32 1.442695, %v1479_v43  ;;  %v1508_v37 = vrot.slane %v1507_v22, 4  ;;  %v2900_v28 = vsel %vm241_vm10, %v2896_v49, 0.0 }
 0x2e1   :  { %v1455_v30 = vrot.slane %v1454_v11, 4  ;;  %v645_v31 = vmax.f32 %v643_v48, %v644_v27  ;;  %v1438_v17 = vrot.slane %v1437_v21, 1  ;;  %v727_v27 = vrot.slane %v726_v10, 1 }
 0x2e2   :  { %v1398_v29 = vpop.xlane.xlu1 %1397  ;;  %v1509_v15 = vadd.f32 %v1508_v37, %v1507_v22  ;;  %2090 = vpow2.f32 %v1491_v62 }
 0x2e3   :  { %v2873_v24 = vsel %vm226_vm12, %v1398_v29, -1e+30  ;;  %v1456_v18 = vmax.f32 %v1454_v11, %v1455_v30  ;;  %v646_v9 = vrot.slane %v645_v31, 1  ;;  %v2891_v11 = vsel %vm241_vm10, %v2178_v23, 0.0  ;;  %v2087_v29 = vpop.eup %2086 }
 0x2e4   :  { %v1426_v20 = vsel %vm241_vm10, %v2873_v24, -inf  ;;  %v2089_v13 = vpop.eup %2088  ;;  %v1439_v3 = vmax.f32 %v1437_v21, %v1438_v17  ;;  %v2903_v19 = vadd.f32 %v727_v27, %v726_v10  ;;  %v2912_v21 = vld [vmem:[%s3387_s1 + $0x20] sm:$0xff] }
 0x2e5   :  { %v1427_v5 = vrot.slane %v1426_v20, 4  ;;  %v1457_v48 = vrot.slane %v1456_v18, 2  ;;  %v647_v12 = vmax.f32 %v645_v31, %v646_v9  ;;  %v1510_v31 = vrot.slane %v1509_v15, 2 }
 0x2e6   :  { %2092 = vrcp.f32 %v2903_v19  ;;  %v1477_v43 = vsub.f32 %v2848_v16, %v1439_v3  ;;  %vm783_vm11 = vweird.f32 %v2903_v19 }
 0x2e7   :  { %v1428_v7 = vmax.f32 %v1426_v20, %v1427_v5  ;;  %v692_v20 = vsub.f32 %v2842_v61, %v654_v54  ;;  %v1458_v23 = vmax.f32 %v1456_v18, %v1457_v48  ;;  %v691_v34 = vsub.f32 %v2854_v1, %v647_v12  ;;  %v2921_v1 = vld [vmem:[%s3387_s1 + $0x28] sm:$0xff]  ;;  %v2933_v54 = vld [vmem:[%s3387_s1 + $0x30] sm:$0xff]  ;;  %v2944_v48 = vld [vmem:[%s3387_s1 + $0x18] sm:$0xff] }
 0x2e8   :  { %v1511_v2 = vadd.f32 %v1510_v31, %v1509_v15  ;;  %v2915_v18 = vmul.f32 %v2912_v21, %v2087_v29  ;;  %v2928_v55 = vsel %vm241_vm10, %v2921_v1, 0.0  ;;  %v2937_v16 = vsel %vm241_vm10, %v2933_v54, 0.0 }
 0x2e9   :  { %v1429_v47 = vrot.slane %v1428_v7, 2  ;;  %v700_v10 = vmul.f32 1.442695, %v691_v34 }
 0x2ea   :  { %v623_v40 = vpop.xlane.xlu1 %622  ;;  %v1512_v17 = vrot.slane %v1511_v2, 1 }
 0x2eb   :  { %v1430_v8 = vmax.f32 %v1428_v7, %v1429_v47  ;;  %v2884_v14 = vsel %vm231_vm0, %v623_v40, -1e+30  ;;  %v702_v7 = vmul.f32 1.442695, %v692_v20  ;;  %v1459_v47 = vrot.slane %v1458_v23, 1 }
 0x2ec   :  { %v676_v33 = vsel %vm241_vm10, %v2884_v14, -inf  ;;  %v2924_v40 = vmul.f32 %v2921_v1, %v2089_v13  ;;  %v2953_v12 = vadd.f32 %v1512_v17, %v1511_v2  ;;  %v1487_v20 = vmul.f32 1.442695, %v1477_v43 }
 0x2ed   :  { %v677_v26 = vrot.slane %v676_v33, 4  ;;  %v1431_v30 = vrot.slane %v1430_v8, 1  ;;  %2094 = vpow2.f32 %v702_v7  ;;  %v787_v7 = vand.u32 2147483647, %v2903_v19 }
 0x2ee   :  { %v757_v62 = vsel %vm241_vm10, %v2924_v40, 0.0  ;;  %2096 = vrcp.f32 %v2953_v12  ;;  %vm1568_vm2 = vweird.f32 %v2953_v12 }
 0x2ef   :  { %v678_v5 = vmax.f32 %v676_v33, %v677_v26  ;;  %v1432_v61 = vmax.f32 %v1430_v8, %v1431_v30  ;;  %v750_v8 = vsel %vm241_vm10, %v2915_v18, 0.0  ;;  %v2948_v33 = vsel %vm241_vm10, %v2944_v48, 0.0  ;;  %v2091_v26 = vpop.eup %2090 }
 0x2f0   :  { %v751_v22 = vrot.slane %v750_v8, 4  ;;  %v758_v27 = vrot.slane %v757_v62, 4  ;;  %v2093_v29 = vpop.eup %2092  ;;  %v1460_v30 = vmax.f32 %v1458_v23, %v1459_v47  ;;  %2098 = vpow2.f32 %v700_v10 }
 0x2f1   :  { %v679_v9 = vrot.slane %v678_v5, 2  ;;  %v1476_v37 = vsub.f32 %v2873_v24, %v1432_v61  ;;  %v779_v34 = vmul.f32 %v2093_v29, %v2903_v19  ;;  %v789_v24 = vand.u32 2147483648, %v2903_v19 }
 0x2f2   :  { %v752_v13 = vadd.f32 %v751_v22, %v750_v8  ;;  %v2962_v23 = vmul.f32 %v2912_v21, %v2091_v26  ;;  %2100 = vpow2.f32 %v1487_v20  ;;  %v1480_v43 = vsub.f32 %v2860_v35, %v1460_v30 }
 0x2f3   :  { %v680_v15 = vmax.f32 %v678_v5, %v679_v9  ;;  %v1485_v2 = vmul.f32 1.442695, %v1476_v37  ;;  %v780_v17 = vsub.f32 1.0, %v779_v34  ;;  %v759_v5 = vadd.f32 %v758_v27, %v757_v62  ;;  %v2095_v8 = vpop.eup %2094 }
 0x2f4   :  { %v753_v61 = vrot.slane %v752_v13, 2  ;;  %vm784_vm9 = vweird.f32 %v2093_v29  ;;  %v1535_v10 = vsel %vm241_vm10, %v2962_v23, 0.0  ;;  %vm2968_vm12 = vcmp.eq.f32.partialorder %v787_v7, 8.507059e+37  ;;  %v2097_v27 = vpop.eup %2096 }
 0x2f5   :  { %v681_v47 = vrot.slane %v680_v15, 1  ;;  %v781_v22 = vmul.f32 %v2093_v29, %v780_v17  ;;  %v760_v39 = vrot.slane %v759_v5, 2  ;;  %v1536_v62 = vrot.slane %v1535_v10, 4  ;;  %vm785_vm13 = vmor %vm783_vm11, %vm784_vm9 }
 0x2f6   :  { %v754_v9 = vadd.f32 %v753_v61, %v752_v13  ;;  %2102 = vpow2.f32 %v1485_v2  ;;  %v790_v30 = vor.u32 1.1754944e-38, %v789_v24  ;;  %v2099_v34 = vpop.eup %2098  ;;  %v1564_v19 = vmul.f32 %v2097_v27, %v2953_v12 }
 0x2f7   :  { %v782_v20 = vadd.f32 %v2093_v29, %v781_v22  ;;  %v761_v13 = vadd.f32 %v760_v39, %v759_v5  ;;  %v2972_v61 = vmax.f32 %v680_v15, %v681_v47  ;;  %v1572_v24 = vand.u32 2147483647, %v2953_v12 }
 0x2f8   :  { %v755_v26 = vrot.slane %v754_v9, 1  ;;  %v1537_v39 = vadd.f32 %v1536_v62, %v1535_v10  ;;  %v2985_v5 = vpop.eup %2100  ;;  %v1565_v22 = vsub.f32 1.0, %v1564_v19  ;;  %vm1569_vm14 = vweird.f32 %v2097_v27  ;;  %v2995_v10 = vld [vmem:[%s3387_s1 + $0x8] sm:$0xff] }
 0x2f9   :  { %v786_v3 = vsel %vm785_vm13, %v2093_v29, %v782_v20  ;;  %v2998_v37 = vmul.f32 %v2995_v10, %v2099_v34  ;;  %v3000_v62 = vmul.f32 1.442695, %v1480_v43  ;;  %vm3005_vm5 = vcmp.eq.f32.partialorder %v1572_v24, 8.507059e+37  ;;  %vm1570_vm1 = vmor %vm1568_vm2, %vm1569_vm14 }
 0x2fa   :  { %v2980_v7 = vadd.f32 %v755_v26, %v754_v9  ;;  %v791_v47 = vsel %vm2968_vm12, %v790_v30, %v786_v3  ;;  %v1574_v9 = vand.u32 2147483648, %v2953_v12  ;;  %v762_v26 = vrot.slane %v761_v13, 1 }
 0x2fb   :  { %v1566_v29 = vmul.f32 %v2097_v27, %v1565_v22  ;;  %v1538_v20 = vrot.slane %v1537_v39, 2  ;;  %v3012_v34 = vmul.f32 %v2896_v49, %v2095_v8 }
 0x2fc   :  { %2104 = vrcp.f32 %v2980_v7  ;;  %v2103_v3 = vpop.eup %2102  ;;  %v3015_v12 = vadd.f32 %v762_v26, %v761_v13  ;;  %v849_v57 = vand.u32 2147483648, %v2980_v7  ;;  %vm843_vm6 = vweird.f32 %v2980_v7 }
 0x2fd   :  { %v617_v35 = vpop.xlane.xlu1 %616  ;;  %v736_v6 = vsel %vm241_vm10, %v3012_v34, 0.0  ;;  %v3037_v30 = vmul.f32 %v2995_v10, %v2103_v3 }
 0x2fe   :  { %v2976_v17 = vsel %vm228_vm15, %v617_v35, -1e+30  ;;  %v792_v35 = vmul.f32 %v791_v47, %v2869_v36  ;;  %v696_v36 = vsub.f32 %v2884_v14, %v2972_v61  ;;  %v1575_v14 = vor.u32 1.1754944e-38, %v1574_v9 }
 0x2ff   :  { %v655_v2 = vsel %vm241_vm10, %v2976_v17, -inf  ;;  %v1539_v61 = vadd.f32 %v1538_v20, %v1537_v39  ;;  %2106 = vrcp.f32 %v3015_v12  ;;  %vm858_vm12 = vweird.f32 %v3015_v12 }
 0x300   :  { %v656_v15 = vrot.slane %v655_v2, 4  ;;  %900 = vperm.xlu2 %2017, %v792_v35  }
 0x302   :  { %v657_v31 = vmax.f32 %v655_v2, %v656_v15  ;;  %v1567_v2 = vadd.f32 %v2097_v27, %v1566_v29  ;;  %v729_v15 = vsel %vm241_vm10, %v2998_v37, 0.0  ;;  %v2105_v24 = vpop.eup %2104 }
 0x303   :  { %v730_v22 = vrot.slane %v729_v15, 4 }
 0x304   :  { %v658_v19 = vrot.slane %v657_v31, 2  ;;  %v1571_v8 = vsel %vm1570_vm1, %v2097_v27, %v1567_v2  ;;  %v1540_v2 = vrot.slane %v1539_v61, 1 }
 0x305   :  { %v1410_v43 = vpop.xlane.xlu1 %1409  ;;  %v1402_v47 = vpop.xlane.xlu0 %1401  ;;  %v1576_v13 = vsel %vm3005_vm5, %v1575_v14, %v1571_v8 }
 0x306   :  { %v659_v35 = vmax.f32 %v657_v31, %v658_v19  ;;  %v3019_v29 = vsel %vm3429_vm3, %v1410_v43, -1e+30  ;;  %v3023_v53 = vsel %vm228_vm15, %v1402_v47, -1e+30  ;;  %v839_v31 = vmul.f32 %v2105_v24, %v2980_v7 }
 0x307   :  { %v1468_v63 = vsel %vm241_vm10, %v3019_v29, -inf  ;;  %v1440_v39 = vsel %vm241_vm10, %v3023_v53, -inf  ;;  %v1577_v20 = vmul.f32 %v1576_v13, %v2880_v60  ;;  %v731_v43 = vadd.f32 %v730_v22, %v729_v15 }
 0x308   :  { %v1469_v9 = vrot.slane %v1468_v63, 4  ;;  %v1441_v26 = vrot.slane %v1440_v39, 4  ;;  %v660_v19 = vrot.slane %v659_v35, 1  ;;  %v840_v27 = vsub.f32 1.0, %v839_v31 }
 0x309   :  { %1685 = vperm.xlu2 %2017, %v1577_v20   ;;  %vm844_vm15 = vweird.f32 %v2105_v24  ;;  %v3039_v8 = vadd.f32 %v1540_v2, %v1539_v61  ;;  %v847_v15 = vand.u32 2147483647, %v2980_v7  ;;  %v732_v3 = vrot.slane %v731_v43, 2 }
 0x30a   :  { %v1470_v47 = vmax.f32 %v1468_v63, %v1469_v9  ;;  %v1442_v0 = vmax.f32 %v1440_v39, %v1441_v26  ;;  %v841_v14 = vmul.f32 %v2105_v24, %v840_v27  ;;  %v661_v63 = vmax.f32 %v659_v35, %v660_v19  ;;  %vm845_vm8 = vmor %vm843_vm6, %vm844_vm15 }
 0x30b   :  { %2108 = vrcp.f32 %v3039_v8  ;;  %v1514_v26 = vsel %vm241_vm10, %v3037_v30, 0.0  ;;  %v710_v20 = vmul.f32 1.442695, %v696_v36  ;;  %v850_v19 = vor.u32 1.1754944e-38, %v849_v57 }
 0x30c   :  { %v1471_v60 = vrot.slane %v1470_v47, 2  ;;  %v1443_v13 = vrot.slane %v1442_v0, 2  ;;  %v842_v39 = vadd.f32 %v2105_v24, %v841_v14  ;;  %vm848_vm4 = vcmp.eq.f32.partialorder %v847_v15, 8.507059e+37 }
 0x30d   :  { %v625_v22 = vpop.xlane.xlu0 %624  ;;  %2110 = vpow2.f32 %v3000_v62 }
 0x30e   :  { %v1472_v31 = vmax.f32 %v1470_v47, %v1471_v60  ;;  %v1444_v9 = vmax.f32 %v1442_v0, %v1443_v13  ;;  %v3047_v61 = vsel %vm3430_vm7, %v625_v22, -1e+30  ;;  %v846_v35 = vsel %vm845_vm8, %v2105_v24, %v842_v39  ;;  %v3054_v0 = vpop.eup %2106 }
 0x30f   :  { %v683_v7 = vsel %vm241_vm10, %v3047_v61, -inf  ;;  %v851_v32 = vsel %vm848_vm4, %v850_v19, %v846_v35  ;;  %v733_v47 = vadd.f32 %v732_v3, %v731_v43  ;;  %v1515_v60 = vrot.slane %v1514_v26, 4 }
 0x310   :  { %v1473_v27 = vrot.slane %v1472_v31, 1  ;;  %v1445_v2 = vrot.slane %v1444_v9, 1  ;;  %v684_v14 = vrot.slane %v683_v7, 4  ;;  %v737_v13 = vrot.slane %v736_v6, 4 }
 0x311   :  { %v693_v22 = vsub.f32 %v2976_v17, %v661_v63  ;;  %v852_v50 = vmul.f32 %v851_v32, %v2915_v18  ;;  %v2109_v38 = vpop.eup %2108  ;;  %2112 = vpow2.f32 %v710_v20  ;;  %v734_v24 = vrot.slane %v733_v47, 1 }
 0x312   :  { %v685_v36 = vmax.f32 %v683_v7, %v684_v14  ;;  %v1474_v57 = vmax.f32 %v1472_v31, %v1473_v27  ;;  %v1516_v39 = vadd.f32 %v1515_v60, %v1514_v26  ;;  %v1446_v56 = vmax.f32 %v1444_v9, %v1445_v2 }
 0x313   :  { %920 = vperm.xlu0 %2015, %v852_v50   ;;  %v1624_v35 = vmul.f32 %v2109_v38, %v3039_v8  ;;  %v854_v43 = vmul.f32 %v3054_v0, %v3015_v12  ;;  %v3062_v62 = vadd.f32 %v734_v24, %v733_v47  ;;  %v862_v63 = vand.u32 2147483647, %v3015_v12  ;;  %v3074_v27 = vpop.eup %2110 }
 0x314   :  { %v686_v15 = vrot.slane %v685_v36, 2  ;;  %v1517_v17 = vrot.slane %v1516_v39, 2  ;;  %v738_v18 = vadd.f32 %v737_v13, %v736_v6  ;;  %v704_v7 = vmul.f32 1.442695, %v693_v22 }
 0x315   :  { %v1408_v3 = vpop.xlane.xlu0 %1407  ;;  %v1632_v50 = vand.u32 2147483647, %v3039_v8  ;;  %v1625_v26 = vsub.f32 1.0, %v1624_v35  ;;  %v1634_v19 = vand.u32 2147483648, %v3039_v8  ;;  %2114 = vrcp.f32 %v3062_v62 }
 0x316   :  { %v687_v20 = vmax.f32 %v685_v36, %v686_v15  ;;  %v3067_v31 = vsel %vm231_vm0, %v1408_v3, -1e+30  ;;  %v1482_v6 = vsub.f32 %v3019_v29, %v1474_v57  ;;  %v1478_v2 = vsub.f32 %v3023_v53, %v1446_v56 }
 0x317   :  { %v1461_v9 = vsel %vm241_vm10, %v3067_v31, -inf  ;;  %v855_v25 = vsub.f32 1.0, %v854_v43  ;;  %v2113_v32 = vpop.eup %2112  ;;  %v1626_v47 = vmul.f32 %v2109_v38, %v1625_v26  ;;  %vm1628_vm0 = vweird.f32 %v3039_v8 }
 0x318   :  { %v1462_v14 = vrot.slane %v1461_v9, 4  ;;  %vm1629_vm9 = vweird.f32 %v2109_v38  ;;  %v1518_v60 = vadd.f32 %v1517_v17, %v1516_v39  ;;  %2116 = vpow2.f32 %v704_v7 }
 0x319   :  { %v688_v13 = vrot.slane %v687_v20, 1  ;;  %vm3079_vm11 = vcmp.eq.f32.partialorder %v1632_v50, 8.507059e+37  ;;  %v1627_v29 = vadd.f32 %v2109_v38, %v1626_v47  ;;  %v1635_v57 = vor.u32 1.1754944e-38, %v1634_v19  ;;  %vm1630_vm14 = vmor %vm1628_vm0, %vm1629_vm9 }
 0x31a   :  { %v1463_v22 = vmax.f32 %v1461_v9, %v1462_v14  ;;  %v1519_v56 = vrot.slane %v1518_v60, 1  ;;  %vm859_vm13 = vweird.f32 %v3054_v0  ;;  %v1497_v53 = vmul.f32 1.442695, %v1482_v6 }
 0x31b   :  { %v1489_v24 = vmul.f32 1.442695, %v1478_v2  ;;  %v856_v39 = vmul.f32 %v3054_v0, %v855_v25  ;;  %v2115_v35 = vpop.eup %2114  ;;  %v1631_v43 = vsel %vm1630_vm14, %v2109_v38, %v1627_v29  ;;  %v3091_v17 = vmul.f32 %v2933_v54, %v2113_v32  ;;  %vm3118_vm15 = vmor %vm858_vm12, %vm859_vm13 }
 0x31c   :  { %v1464_v15 = vrot.slane %v1463_v22, 2  ;;  %v3088_v3 = vadd.f32 %v1519_v56, %v1518_v60  ;;  %v739_v7 = vrot.slane %v738_v18, 2  ;;  %v689_v50 = vmax.f32 %v687_v20, %v688_v13 }
 0x31d   :  { %v1636_v26 = vsel %vm3079_vm11, %v1635_v57, %v1631_v43  ;;  %v794_v19 = vmul.f32 %v2115_v35, %v3062_v62  ;;  %v802_v6 = vand.u32 2147483647, %v3062_v62  ;;  %v804_v2 = vand.u32 2147483648, %v3062_v62 }
 0x31e   :  { %v1465_v9 = vmax.f32 %v1463_v22, %v1464_v15  ;;  %v1637_v8 = vmul.f32 %v1636_v26, %v2962_v23  ;;  %2118 = vrcp.f32 %v3088_v3  ;;  %vm3100_vm2 = vcmp.eq.f32.partialorder %v862_v63, 8.507059e+37  ;;  %v2117_v14 = vpop.eup %2116 }
 0x31f   :  { %v795_v25 = vsub.f32 1.0, %v794_v19  ;;  %v857_v32 = vadd.f32 %v3054_v0, %v856_v39  ;;  %v864_v47 = vand.u32 2147483648, %v3015_v12  ;;  %2120 = vpow2.f32 %v1497_v53 }
 0x320   :  { %v1466_v20 = vrot.slane %v1465_v9, 1  ;;  %1705 = vperm.xlu2 %2017, %v1637_v8   ;;  %vm798_vm5 = vweird.f32 %v3062_v62  ;;  %v764_v23 = vsel %vm241_vm10, %v3091_v17, 0.0  ;;  %v740_v60 = vadd.f32 %v739_v7, %v738_v18 }
 0x321   :  { %2122 = vpow2.f32 %v1489_v24  ;;  %v697_v63 = vsub.f32 %v3047_v61, %v689_v50  ;;  %v796_v13 = vmul.f32 %v2115_v35, %v795_v25  ;;  %vm799_vm1 = vweird.f32 %v2115_v35 }
 0x322   :  { %vm3110_vm3 = vcmp.eq.f32.partialorder %v802_v6, 8.507059e+37  ;;  %v805_v36 = vor.u32 1.1754944e-38, %v804_v2  ;;  %v765_v57 = vrot.slane %v764_v23, 4  ;;  %v741_v18 = vrot.slane %v740_v60, 1  ;;  %vm800_vm6 = vmor %vm798_vm5, %vm799_vm1 }
 0x323   :  { %v1467_v56 = vmax.f32 %v1465_v9, %v1466_v20  ;;  %v797_v53 = vadd.f32 %v2115_v35, %v796_v13  ;;  %v861_v61 = vsel %vm3118_vm15, %v3054_v0, %v857_v32  ;;  %v865_v24 = vor.u32 1.1754944e-38, %v864_v47 }
 0x324   :  { %v2119_v15 = vpop.eup %2118  ;;  %v766_v39 = vadd.f32 %v765_v57, %v764_v23  ;;  %v3127_v43 = vadd.f32 %v741_v18, %v740_v60  ;;  %v3131_v12 = vmul.f32 %v2921_v1, %v3074_v27  ;;  %v3134_v7 = vmul.f32 %v2944_v48, %v2117_v14 }
 0x325   :  { %v712_v50 = vmul.f32 1.442695, %v697_v63  ;;  %v801_v9 = vsel %vm800_vm6, %v2115_v35, %v797_v53  ;;  %v1579_v26 = vmul.f32 %v2119_v15, %v3088_v3  ;;  %v1587_v0 = vand.u32 2147483647, %v3088_v3  ;;  %v2121_v19 = vpop.eup %2120 }
 0x326   :  { %v806_v62 = vsel %vm3110_vm3, %v805_v36, %v801_v9  ;;  %v767_v8 = vrot.slane %v766_v39, 2  ;;  %2124 = vrcp.f32 %v3127_v43  ;;  %v3143_v1 = vmul.f32 %v2896_v49, %v2985_v5 }
 0x327   :  { %v3145_v27 = vpop.eup %2122  ;;  %v807_v6 = vmul.f32 %v806_v62, %v2998_v37  ;;  %v1580_v35 = vsub.f32 1.0, %v1579_v26  ;;  %v1589_v2 = vand.u32 2147483648, %v3088_v3  ;;  %v866_v14 = vsel %vm3100_vm2, %v865_v24, %v861_v61 }
 0x328   :  { %v1481_v20 = vsub.f32 %v3067_v31, %v1467_v56  ;;  %v768_v25 = vadd.f32 %v767_v8, %v766_v39  ;;  %v1542_v32 = vsel %vm241_vm10, %v3131_v12, 0.0  ;;  %v743_v49 = vsel %vm241_vm10, %v3134_v7, 0.0 }
 0x329   :  { %905 = vperm.xlu1 %2016, %v807_v6   ;;  %v1581_v5 = vmul.f32 %v2119_v15, %v1580_v35  ;;  %vm1584_vm7 = vweird.f32 %v2119_v15  ;;  %v1543_v47 = vrot.slane %v1542_v32, 4  ;;  %v744_v37 = vrot.slane %v743_v49, 4 }
 0x32a   :  { %2126 = vpow2.f32 %v712_v50  ;;  %vm1583_vm8 = vweird.f32 %v3088_v3  ;;  %v769_v23 = vrot.slane %v768_v25, 1  ;;  %v1521_v38 = vsel %vm241_vm10, %v3143_v1, 0.0 }
 0x32b   :  { %v1582_v31 = vadd.f32 %v2119_v15, %v1581_v5  ;;  %vm1588_vm4 = vcmp.eq.f32.partialorder %v1587_v0, 8.507059e+37  ;;  %v1590_v60 = vor.u32 1.1754944e-38, %v1589_v2  ;;  %v1544_v63 = vadd.f32 %v1543_v47, %v1542_v32  ;;  %vm1585_vm0 = vmor %vm1583_vm8, %vm1584_vm7 }
 0x32c   :  { %v2125_v13 = vpop.eup %2124  ;;  %v867_v22 = vmul.f32 %v866_v14, %v2924_v40  ;;  %v3160_v36 = vadd.f32 %v769_v23, %v768_v25  ;;  %v745_v29 = vadd.f32 %v744_v37, %v743_v49  ;;  %v1522_v57 = vrot.slane %v1521_v38, 4 }
 0x32d   :  { %v1495_v18 = vmul.f32 1.442695, %v1481_v20  ;;  %v1586_v56 = vsel %vm1585_vm0, %v2119_v15, %v1582_v31  ;;  %v809_v3 = vmul.f32 %v2125_v13, %v3127_v43  ;;  %v1545_v53 = vrot.slane %v1544_v63, 2 }
 0x32e   :  { %v1591_v61 = vsel %vm1588_vm4, %v1590_v60, %v1586_v56  ;;  %2128 = vrcp.f32 %v3160_v36  ;;  %vm813_vm9 = vweird.f32 %v3127_v43  ;;  %v817_v24 = vand.u32 2147483647, %v3127_v43 }
 0x32f   :  { %v1592_v39 = vmul.f32 %v1591_v61, %v3037_v30  ;;  %v810_v50 = vsub.f32 1.0, %v809_v3  ;;  %v819_v40 = vand.u32 2147483648, %v3127_v43  ;;  %v1546_v9 = vadd.f32 %v1545_v53, %v1544_v63  ;;  %v3175_v30 = vld [vmem:[%s3387_s1 + $0x38] sm:$0xff]  ;;  %s2214_s1 = smov [#allocation2]  }
 0x330   :  { %v2127_v26 = vpop.eup %2126  ;;  %vm814_vm11 = vweird.f32 %v2125_v13  ;;  %v746_v0 = vrot.slane %v745_v29, 2  ;;  %v1523_v15 = vadd.f32 %v1522_v57, %v1521_v38  ;;  %v3439_v62 = vrot.slane %v2891_v11, 4  ;;  %s1969_s23 = sshll.u32 %s2214_s1, 4  ;;  %s1970_s23 = int_to_ptr.vmem [resolvable:$true] %s1969_s23 }
 0x331   :  { %1690 = vperm.xlu0 %2015, %v1592_v39   ;;  %925 = vperm.xlu1 %2016, %v867_v22   ;;  %v877_v6 = vand.u32 2147483647, %v3160_v36  ;;  %v811_v35 = vmul.f32 %v2125_v13, %v810_v50  ;;  %v1547_v2 = vrot.slane %v1546_v9, 1  ;;  %v3178_v14 = vmul.f32 %v3175_v30, %v2121_v19  ;;  %vm815_vm13 = vmor %vm813_vm9, %vm814_vm11 }
 0x332   :  { %v1781_v8 = vadd.f32 %v3439_v62, %v2891_v11  ;;  %v879_v20 = vand.u32 2147483648, %v3160_v36  ;;  %v747_v25 = vadd.f32 %v746_v0, %v745_v29  ;;  %v1524_v32 = vrot.slane %v1523_v15, 2 }
 0x333   :  { %2130 = vpow2.f32 %v1495_v18  ;;  %v812_v11 = vadd.f32 %v2125_v13, %v811_v35  ;;  %vm818_vm12 = vcmp.eq.f32.partialorder %v817_v24, 8.507059e+37  ;;  %v3181_v5 = vadd.f32 %v1547_v2, %v1546_v9 }
 0x334   :  { %v1782_v49 = vrot.slane %v1781_v8, 2  ;;  %v2129_v47 = vpop.eup %2128  ;;  %v820_v37 = vor.u32 1.1754944e-38, %v819_v40  ;;  %v748_v23 = vrot.slane %v747_v25, 1  ;;  %v1525_v38 = vadd.f32 %v1524_v32, %v1523_v15 }
 0x335   :  { %v869_v31 = vmul.f32 %v2129_v47, %v3160_v36  ;;  %v816_v60 = vsel %vm815_vm13, %v2125_v13, %v812_v11  ;;  %2132 = vrcp.f32 %v3181_v5  ;;  %v1556_v63 = vsel %vm241_vm10, %v3178_v14, 0.0 }
 0x336   :  { %v1783_v19 = vadd.f32 %v1782_v49, %v1781_v8  ;;  %vm873_vm14 = vweird.f32 %v3160_v36  ;;  %vm3191_vm2 = vcmp.eq.f32.partialorder %v877_v6, 8.507059e+37  ;;  %v880_v43 = vor.u32 1.1754944e-38, %v879_v20 }
 0x337   :  { %v821_v29 = vsel %vm818_vm12, %v820_v37, %v816_v60  ;;  %v870_v57 = vsub.f32 1.0, %v869_v31  ;;  %v3196_v56 = vadd.f32 %v748_v23, %v747_v25  ;;  %v1526_v3 = vrot.slane %v1525_v38, 1 }
 0x338   :  { %v822_v18 = vmul.f32 %v821_v29, %v3012_v34  ;;  %v1647_v13 = vand.u32 2147483647, %v3181_v5  ;;  %v1784_v53 = vrot.slane %v1783_v19, 1  ;;  %v3442_v61 = vrot.slane %v2948_v33, 4 }
 0x339   :  { %v1557_v39 = vrot.slane %v1556_v63, 4  ;;  %v2131_v50 = vpop.eup %2130  ;;  %v871_v40 = vmul.f32 %v2129_v47, %v870_v57  ;;  %vm874_vm5 = vweird.f32 %v2129_v47  ;;  %v1649_v9 = vand.u32 2147483648, %v3181_v5 }
 0x33a   :  { %v1802_v24 = vadd.f32 %v3442_v61, %v2948_v33  ;;  %910 = vperm.xlu0 %2015, %v822_v18   ;;  %2134 = vrcp.f32 %v3196_v56  ;;  %v3204_v34 = vadd.f32 %v1526_v3, %v1525_v38  ;;  %v1785_v0 = vadd.f32 %v1784_v53, %v1783_v19  ;;  %vm875_vm3 = vmor %vm873_vm14, %vm874_vm5 }
 0x33b   :  { %v3208_v62 = vmul.f32 %v2944_v48, %v3145_v27  ;;  %v2133_v8 = vpop.eup %2132  ;;  %v872_v6 = vadd.f32 %v2129_v47, %v871_v40  ;;  %vm1643_vm1 = vweird.f32 %v3181_v5  ;;  %v834_v33 = vand.u32 2147483648, %v3196_v56 }
 0x33c   :  { %v1803_v15 = vrot.slane %v1802_v24, 2  ;;  %v3213_v35 = vmul.f32 %v3175_v30, %v2127_v26  ;;  %v1639_v2 = vmul.f32 %v2133_v8, %v3181_v5  ;;  %vm3218_vm15 = vcmp.eq.f32.partialorder %v1647_v13, 8.507059e+37 }
 0x33d   :  { %v832_v48 = vand.u32 2147483647, %v3196_v56  ;;  %2136 = vrcp.f32 %v3204_v34  ;;  %v876_v27 = vsel %vm875_vm3, %v2129_v47, %v872_v6  ;;  %vm1644_vm6 = vweird.f32 %v2133_v8 }
 0x33e   :  { %v1650_v25 = vor.u32 1.1754944e-38, %v1649_v9  ;;  %v1558_v32 = vadd.f32 %v1557_v39, %v1556_v63  ;;  %v881_v26 = vsel %vm3191_vm2, %v880_v43, %v876_v27  ;;  %v1640_v49 = vsub.f32 1.0, %v1639_v2  ;;  %vm1645_vm9 = vmor %vm1643_vm1, %vm1644_vm6 }
 0x33f   :  { %vm828_vm7 = vweird.f32 %v3196_v56  ;;  %2138 = vlog2.f32 %v1785_v0  ;;  %v1804_v36 = vadd.f32 %v1803_v15, %v1802_v24  ;;  %v882_v37 = vmul.f32 %v881_v26, %v3091_v17 }
 0x340   :  { %v2135_v11 = vpop.eup %2134  ;;  %v835_v23 = vor.u32 1.1754944e-38, %v834_v33  ;;  %v1602_v38 = vand.u32 2147483647, %v3204_v34  ;;  %v771_v47 = vsel %vm241_vm10, %v3213_v35, 0.0  ;;  %v1641_v19 = vmul.f32 %v2133_v8, %v1640_v49 }
 0x341   :  { %v824_v31 = vmul.f32 %v2135_v11, %v3196_v56  ;;  %vm3232_vm8 = vcmp.eq.f32.partialorder %v832_v48, 8.507059e+37  ;;  %v1604_v63 = vand.u32 2147483648, %v3204_v34  ;;  %v1805_v22 = vrot.slane %v1804_v36, 1  ;;  %930 = vperm.xlu2 %2017, %v882_v37  }
 0x342   :  { %vm829_vm4 = vweird.f32 %v2135_v11  ;;  %vm1598_vm0 = vweird.f32 %v3204_v34  ;;  %v772_v17 = vrot.slane %v771_v47, 4  ;;  %v3447_v43 = vrot.slane %v2937_v16, 4 }
 0x343   :  { %v1559_v57 = vrot.slane %v1558_v32, 2  ;;  %v2137_v18 = vpop.eup %2136  ;;  %v1642_v3 = vadd.f32 %v2133_v8, %v1641_v19  ;;  %v825_v13 = vsub.f32 1.0, %v824_v31  ;;  %v1806_v53 = vadd.f32 %v1805_v22, %v1804_v36  ;;  %vm830_vm12 = vmor %vm828_vm7, %vm829_vm4 }
 0x344   :  { %v1823_v29 = vadd.f32 %v3447_v43, %v2937_v16  ;;  %v3242_v61 = vmul.f32 %v2933_v54, %v2131_v50  ;;  %v1594_v24 = vmul.f32 %v2137_v18, %v3204_v34  ;;  %vm1599_vm11 = vweird.f32 %v2137_v18 }
 0x345   :  { %v773_v39 = vadd.f32 %v772_v17, %v771_v47  ;;  %v2139_v9 = vpop.eup %2138  ;;  %v1646_v0 = vsel %vm1645_vm9, %v2133_v8, %v1642_v3  ;;  %v826_v16 = vmul.f32 %v2135_v11, %v825_v13  ;;  %2140 = vlog2.f32 %v1806_v53  ;;  %vm1600_vm14 = vmor %vm1598_vm0, %vm1599_vm11 }
 0x346   :  { %v1824_v40 = vrot.slane %v1823_v29, 2  ;;  %v1560_v15 = vadd.f32 %v1559_v57, %v1558_v32  ;;  %v1651_v6 = vsel %vm3218_vm15, %v1650_v25, %v1646_v0  ;;  %v1595_v33 = vsub.f32 1.0, %v1594_v24 }
 0x347   :  { %v1836_v54 = vmul.f32 0.6931472, %v2139_v9  ;;  %v774_v50 = vrot.slane %v773_v39, 2  ;;  %v1652_v2 = vmul.f32 %v1651_v6, %v3131_v12  ;;  %v827_v5 = vadd.f32 %v2135_v11, %v826_v16 }
 0x348   :  { %v1825_v48 = vadd.f32 %v1824_v40, %v1823_v29  ;;  %v1561_v27 = vrot.slane %v1560_v15, 1  ;;  %v1596_v26 = vmul.f32 %v2137_v18, %v1595_v33  ;;  %v1549_v32 = vsel %vm241_vm10, %v3242_v61, 0.0 }
 0x349   :  { %v1851_v8 = vmul.f32 0.03125, %v1836_v54  ;;  %v775_v49 = vadd.f32 %v774_v50, %v773_v39  ;;  %1710 = vperm.xlu1 %2016, %v1652_v2   ;;  %v831_v20 = vsel %vm830_vm12, %v2135_v11, %v827_v5  ;;  %vm3256_vm13 = vcmp.eq.f32.partialorder %v1602_v38, 8.507059e+37 }
 0x34a   :  { %v1826_v12 = vrot.slane %v1825_v48, 1  ;;  %v3260_v36 = vadd.f32 %v1561_v27, %v1560_v15  ;;  %v836_v37 = vsel %vm3232_vm8, %v835_v23, %v831_v20  ;;  %v1597_v56 = vadd.f32 %v2137_v18, %v1596_v26 }
 0x34b   :  { %v1605_v47 = vor.u32 1.1754944e-38, %v1604_v63  ;;  %v776_v19 = vrot.slane %v775_v49, 1  ;;  %v2141_v31 = vpop.eup %2140  ;;  %v837_v22 = vmul.f32 %v836_v37, %v3134_v7  ;;  %v1550_v38 = vrot.slane %v1549_v32, 4 }
 0x34c   :  { %v1827_v11 = vadd.f32 %v1826_v12, %v1825_v48  ;;  %2142 = vrcp.f32 %v3260_v36  ;;  %v1601_v17 = vsel %vm1600_vm14, %v2137_v18, %v1597_v56  ;;  %v1859_v43 = vmul.f32 1.442695, %v1851_v8 }
 0x34d   :  { %v1842_v29 = vmul.f32 0.6931472, %v2141_v31  ;;  %v3269_v57 = vadd.f32 %v776_v19, %v775_v49  ;;  %915 = vperm.xlu2 %2017, %v837_v22   ;;  %v1606_v23 = vsel %vm3256_vm13, %v1605_v47, %v1601_v17  ;;  %v1528_v7 = vsel %vm241_vm10, %v3208_v62, 0.0 }
 0x34e   :  { %2144 = vlog2.f32 %v1827_v11  ;;  %v1786_v34 = vsel %vm241_vm10, %v2995_v10, 0.0  ;;  %v1815_v63 = vrot.slane %v2928_v55, 4  ;;  %v1607_v18 = vmul.f32 %v1606_v23, %v3143_v1 }
 0x34f   :  { %v1854_v60 = vmul.f32 0.03125, %v1842_v29  ;;  %2146 = vrcp.f32 %v3269_v57  ;;  %v1551_v3 = vadd.f32 %v1550_v38, %v1549_v32  ;;  %v3450_v13 = vrot.slane %v2900_v28, 4 }
 0x350   :  { %2148 = vpow2.f32 %v1859_v43  ;;  %v1529_v24 = vrot.slane %v1528_v7, 4  ;;  %v3287_v40 = vsel %vm241_vm10, %v2912_v21, 0.0  ;;  %v1787_v16 = vrot.slane %v1786_v34, 4 }
 0x351   :  { %v1795_v53 = vadd.f32 %v3450_v13, %v2900_v28  ;;  %1695 = vperm.xlu1 %2016, %v1607_v18   ;;  %v1865_v9 = vmul.f32 1.442695, %v1854_v60  ;;  %v1552_v0 = vrot.slane %v1551_v3, 2  ;;  %v892_v15 = vand.u32 2147483647, %v3269_v57 }
 0x352   :  { %v3283_v39 = vpop.eup %2142  ;;  %v1530_v33 = vadd.f32 %v1529_v24, %v1528_v7  ;;  %v1816_v5 = vadd.f32 %v1815_v63, %v2928_v55  ;;  %v894_v48 = vand.u32 2147483648, %v3269_v57  ;;  %v1788_v37 = vadd.f32 %v1787_v16, %v1786_v34 }
 0x353   :  { %v1669_v10 = vmul.f32 %v3283_v39, %v3260_v36  ;;  %v1796_v6 = vrot.slane %v1795_v53, 2  ;;  %v1553_v2 = vadd.f32 %v1552_v0, %v1551_v3  ;;  %2150 = vpow2.f32 %v1865_v9 }
 0x354   :  { %v2145_v1 = vpop.eup %2144  ;;  %v1531_v26 = vrot.slane %v1530_v33, 2  ;;  %v1817_v32 = vrot.slane %v1816_v5, 2  ;;  %v1789_v38 = vrot.slane %v1788_v37, 2  ;;  %v1808_v17 = vrot.slane %v3287_v40, 4 }
 0x355   :  { %v2147_v28 = vpop.eup %2146  ;;  %v1848_v54 = vmul.f32 0.6931472, %v2145_v1  ;;  %v1670_v50 = vsub.f32 1.0, %v1669_v10  ;;  %v1797_v27 = vadd.f32 %v1796_v6, %v1795_v53  ;;  %v1554_v49 = vrot.slane %v1553_v2, 1 }
 0x356   :  { %v884_v21 = vmul.f32 %v2147_v28, %v3269_v57  ;;  %v2149_v8 = vpop.eup %2148  ;;  %vm889_vm2 = vweird.f32 %v2147_v28  ;;  %v1532_v12 = vadd.f32 %v1531_v26, %v1530_v33  ;;  %v1818_v55 = vadd.f32 %v1817_v32, %v1816_v5 }
 0x357   :  { %v1798_v25 = vrot.slane %v1797_v27, 1  ;;  %v1857_v56 = vmul.f32 0.03125, %v1848_v54  ;;  %v1671_v47 = vmul.f32 %v3283_v39, %v1670_v50  ;;  %v3296_v19 = vadd.f32 %v1554_v49, %v1553_v2 }
 0x358   :  { %v885_v20 = vsub.f32 1.0, %v884_v21  ;;  %v1533_v11 = vrot.slane %v1532_v12, 1  ;;  %v1828_v43 = vsel %vm241_vm10, %v3175_v30, 0.0  ;;  %vm888_vm5 = vweird.f32 %v3269_v57 }
 0x359   :  { %1901 = vperm.xlu1 %2016, %v2149_v8   ;;  %v1799_v22 = vadd.f32 %v1798_v25, %v1797_v27  ;;  %v1679_v29 = vand.u32 2147483648, %v3260_v36  ;;  %v895_v7 = vor.u32 1.1754944e-38, %v894_v48  ;;  %vm1674_vm1 = vweird.f32 %v3283_v39  ;;  %v2151_v60 = vpop.eup %2150  ;;  %vm890_vm3 = vmor %vm888_vm5, %vm889_vm2 }
 0x35a   :  { %v886_v31 = vmul.f32 %v2147_v28, %v885_v20  ;;  %2152 = vrcp.f32 %v3296_v19  ;;  %v1871_v34 = vmul.f32 1.442695, %v1857_v56  ;;  %v1672_v63 = vadd.f32 %v3283_v39, %v1671_v47 }
 0x35b   :  { %2154 = vlog2.f32 %v1799_v22  ;;  %v3307_v18 = vadd.f32 %v1533_v11, %v1532_v12  ;;  %vm893_vm10 = vcmp.eq.f32.partialorder %v892_v15, 8.507059e+37  ;;  %v1819_v57 = vrot.slane %v1818_v55, 1 }
 0x35c   :  { %v887_v23 = vadd.f32 %v2147_v28, %v886_v31  ;;  %v1790_v3 = vadd.f32 %v1789_v38, %v1788_v37  ;;  %vm1673_vm15 = vweird.f32 %v3260_v36  ;;  %v1677_v53 = vand.u32 2147483647, %v3260_v36 }
 0x35d   :  { %2156 = vrcp.f32 %v3307_v18  ;;  %v1829_v24 = vrot.slane %v1828_v43, 4  ;;  %vm3315_vm6 = vmor %vm1673_vm15, %vm1674_vm1  ;;  %v1820_v0 = vadd.f32 %v1819_v57, %v1818_v55  ;;  %v1809_v36 = vadd.f32 %v1808_v17, %v3287_v40 }
 0x35e   :  { %v891_v30 = vsel %vm890_vm3, %v2147_v28, %v887_v23  ;;  %2158 = vpow2.f32 %v1871_v34  ;;  %v1676_v1 = vsel %vm3315_vm6, %v3283_v39, %v1672_v63  ;;  %v1791_v16 = vrot.slane %v1790_v3, 1 }
 0x35f   :  { %v896_v13 = vsel %vm893_vm10, %v895_v7, %v891_v30  ;;  %v1680_v6 = vor.u32 1.1754944e-38, %v1679_v29  ;;  %2160 = vlog2.f32 %v1820_v0  ;;  %vm1678_vm7 = vcmp.eq.f32.partialorder %v1677_v53, 8.507059e+37 }
 0x360   :  { %v897_v9 = vmul.f32 %v896_v13, %v3213_v35  ;;  %v2153_v15 = vpop.eup %2152  ;;  %v1792_v28 = vadd.f32 %v1791_v16, %v1790_v3  ;;  %v1810_v54 = vrot.slane %v1809_v36, 2  ;;  %v1662_v2 = vand.u32 2147483647, %v3296_v19 }
 0x361   :  { %1916 = vperm.xlu1 %2016, %v2151_v60   ;;  %v2155_v35 = vpop.eup %2154  ;;  %v1654_v33 = vmul.f32 %v2153_v15, %v3296_v19  ;;  %v1681_v50 = vsel %vm1678_vm7, %v1680_v6, %v1676_v1  ;;  %v1664_v5 = vand.u32 2147483648, %v3296_v19  ;;  %v1830_v27 = vadd.f32 %v1829_v24, %v1828_v43 }
 0x362   :  { %935 = vperm.xlu2 %2017, %v897_v9   ;;  %v1840_v39 = vmul.f32 0.6931472, %v2155_v35  ;;  %2162 = vlog2.f32 %v1792_v28  ;;  %v1811_v40 = vadd.f32 %v1810_v54, %v1809_v36  ;;  %vm1658_vm8 = vweird.f32 %v3296_v19 }
 0x363   :  { %v2157_v21 = vpop.eup %2156  ;;  %v1655_v48 = vsub.f32 1.0, %v1654_v33  ;;  %vm1659_vm4 = vweird.f32 %v2153_v15  ;;  %v1831_v25 = vrot.slane %v1830_v27, 2  ;;  %v1682_v37 = vmul.f32 %v1681_v50, %v3178_v14 }
 0x364   :  { %v1853_v26 = vmul.f32 0.03125, %v1840_v39  ;;  %v1609_v8 = vmul.f32 %v2157_v21, %v3307_v18  ;;  %v2159_v49 = vpop.eup %2158  ;;  %v1812_v20 = vrot.slane %v1811_v40, 1  ;;  %vm3329_vm0 = vcmp.eq.f32.partialorder %v1662_v2, 8.507059e+37  ;;  %vm1660_vm9 = vmor %vm1658_vm8, %vm1659_vm4 }
 0x365   :  { %v1656_v32 = vmul.f32 %v2153_v15, %v1655_v48  ;;  %v2161_v12 = vpop.eup %2160  ;;  %v1665_v22 = vor.u32 1.1754944e-38, %v1664_v5  ;;  %vm1613_vm11 = vweird.f32 %v3307_v18  ;;  %v1832_v14 = vadd.f32 %v1831_v25, %v1830_v27  ;;  %v901_v5 = vpop.permute.xlu2 %900 }
 0x366   :  { %v1863_v47 = vmul.f32 1.442695, %v1853_v26  ;;  %v1610_v55 = vsub.f32 1.0, %v1609_v8  ;;  %v1846_v11 = vmul.f32 0.6931472, %v2161_v12  ;;  %v1813_v38 = vadd.f32 %v1812_v20, %v1811_v40 }
 0x367   :  { %v1657_v31 = vadd.f32 %v2153_v15, %v1656_v32  ;;  %vm1614_vm12 = vweird.f32 %v2157_v21  ;;  %v1619_v34 = vand.u32 2147483648, %v3307_v18  ;;  %v1617_v30 = vand.u32 2147483647, %v3307_v18 }
 0x368   :  { %2164 = vpow2.f32 %v1863_v47  ;;  %v1611_v17 = vmul.f32 %v2157_v21, %v1610_v55  ;;  %v2163_v43 = vpop.eup %2162  ;;  %v1856_v23 = vmul.f32 0.03125, %v1846_v11  ;;  %v1833_v3 = vrot.slane %v1832_v14, 1  ;;  %vm1615_vm13 = vmor %vm1613_vm11, %vm1614_vm12 }
 0x369   :  { %1931 = vperm.xlu1 %2016, %v2159_v49   ;;  %v1661_v29 = vsel %vm1660_vm9, %v2153_v15, %v1657_v31  ;;  %2166 = vlog2.f32 %v1813_v38  ;;  %v1838_v63 = vmul.f32 0.6931472, %v2163_v43  ;;  %v1620_v10 = vor.u32 1.1754944e-38, %v1619_v34 }
 0x36a   :  { %1720 = vperm.xlu2 %2017, %v1682_v37   ;;  %v1666_v7 = vsel %vm3329_vm0, %v1665_v22, %v1661_v29  ;;  %v1612_v60 = vadd.f32 %v2157_v21, %v1611_v17  ;;  %v1869_v57 = vmul.f32 1.442695, %v1856_v23  ;;  %v1834_v24 = vadd.f32 %v1833_v3, %v1832_v14 }
 0x36b   :  { %v1667_v19 = vmul.f32 %v1666_v7, %v3242_v61  ;;  %v1852_v13 = vmul.f32 0.03125, %v1838_v63  ;;  %vm1618_vm14 = vcmp.eq.f32.partialorder %v1617_v30, 8.507059e+37  ;;  %v938_v49 = vmul.f32 %v901_v5, %v2310_v41 }
 0x36c   :  { %v1616_v53 = vsel %vm1615_vm13, %v2157_v21, %v1612_v60  ;;  %2168 = vpow2.f32 %v1869_v57  ;;  %vm1883_vm2 = vcmask 1041409   ;;  %vm1885_vm5 = vcmask 1042434  }
 0x36d   :  { %1715 = vperm.xlu0 %2015, %v1667_v19   ;;  %2170 = vlog2.f32 %v1834_v24  ;;  %v1621_v1 = vsel %vm1618_vm14, %v1620_v10, %v1616_v53  ;;  %v1861_v61 = vmul.f32 1.442695, %v1852_v13  ;;  %v3344_v21 = vpop.permute.xlu2 %1685  ;;  %v946_v12 = vrot.slane %v938_v49, 4 }
 0x36e   :  { %v2165_v9 = vpop.eup %2164  ;;  %v1622_v36 = vmul.f32 %v1621_v1, %v3208_v62  ;;  %vm1887_vm1 = vcmask 1043459   ;;  %vm1889_vm3 = vcmask 1044484   ;;  %vm1891_vm10 = vcmask 1045509  }
 0x36f   :  { %v2167_v0 = vpop.eup %2166  ;;  %2172 = vpow2.f32 %v1861_v61  ;;  %v947_v17 = vadd.f32 %v946_v12, %v938_v49  ;;  %vm1893_vm15 = vcmask 1046534   ;;  %vm1895_vm6 = vcmask 1047559  }
 0x370   :  { %v1844_v16 = vmul.f32 0.6931472, %v2167_v0 }
 0x371   :  { %v948_v7 = vrot.slane %v947_v17, 2 }
 0x372   :  { %1911 = vperm.xlu2 %2017, %v2165_v9   ;;  %v2169_v15 = vpop.eup %2168  ;;  %v1855_v18 = vmul.f32 0.03125, %v1844_v16 }
 0x373   :  { %v2171_v6 = vpop.eup %2170  ;;  %v949_v30 = vadd.f32 %v948_v7, %v947_v17 }
 0x374   :  { %v1867_v35 = vmul.f32 1.442695, %v1855_v18  ;;  %v1850_v33 = vmul.f32 0.6931472, %v2171_v6 }
 0x375   :  { %1700 = vperm.xlu0 %2015, %v1622_v36   ;;  %v2173_v28 = vpop.eup %2172  ;;  %v950_v9 = vrot.slane %v949_v30, 1 }
 0x376   :  { %2174 = vpow2.f32 %v1867_v35  ;;  %v1858_v54 = vmul.f32 0.03125, %v1850_v33 }
 0x377   :  { %v951_v6 = vadd.f32 %v950_v9, %v949_v30 }
 0x378   :  { %v1873_v50 = vmul.f32 1.442695, %v1858_v54 }
 0x37a   :  { %1926 = vperm.xlu2 %2017, %v2169_v15   ;;  %2176 = vpow2.f32 %v1873_v50  ;;  %v3346_v62 = vpop.permute.xlu2 %1705 }
 0x37c   :  { %v2175_v2 = vpop.eup %2174 }
 0x37d   :  { %1906 = vperm.xlu0 %2015, %v2173_v28  }
 0x380   :  { %v2177_v39 = vpop.eup %2176 }
 0x385   :  { %1921 = vperm.xlu0 %2015, %v2175_v2   ;;  %v921_v48 = vpop.permute.xlu0 %920 }
 0x386   :  { %v942_v47 = vmul.f32 %v921_v48, %v2315_v44 }
 0x388   :  { %v970_v41 = vrot.slane %v942_v47, 4 }
 0x38a   :  { %v971_v34 = vadd.f32 %v970_v41, %v942_v47  ;;  %v3456_v41 = vld [vmem:[#allocation5_spill] sm:$0xff] }
 0x38d   :  { %1936 = vperm.xlu0 %2015, %v2177_v39  }
 0x39b   :  { %v931_v40 = vpop.permute.xlu2 %930  ;;  %v906_v27 = vpop.permute.xlu1 %905 }
 0x39c   :  { %v939_v8 = vmul.f32 %v906_v27, %v2317_v45  ;;  %v944_v45 = vmul.f32 %v931_v40, %v2337_v58 }
 0x39e   :  { %v952_v20 = vrot.slane %v939_v8, 4  ;;  %v982_v60 = vrot.slane %v944_v45, 4 }
 0x3a0   :  { %v953_v31 = vadd.f32 %v952_v20, %v939_v8  ;;  %v983_v57 = vadd.f32 %v982_v60, %v944_v45 }
 0x3a2   :  { %v954_v43 = vrot.slane %v953_v31, 2  ;;  %v984_v10 = vrot.slane %v983_v57, 2 }
 0x3a3   :  { %v3348_v26 = vpop.permute.xlu0 %1690  ;;  %v926_v37 = vpop.permute.xlu1 %925 }
 0x3a4   :  { %v943_v11 = vmul.f32 %v926_v37, %v2326_v51  ;;  %v955_v44 = vadd.f32 %v954_v43, %v953_v31  ;;  %v972_v51 = vrot.slane %v971_v34, 2  ;;  %v985_v35 = vadd.f32 %v984_v10, %v983_v57  ;;  %v3459_v57 = vld [vmem:[#allocation10_spill] sm:$0xff] }
 0x3a6   :  { %v956_v3 = vrot.slane %v955_v44, 1  ;;  %v973_v1 = vadd.f32 %v972_v51, %v971_v34 }
 0x3a7   :  { %v916_v32 = vpop.permute.xlu2 %915 }
 0x3a8   :  { %v941_v25 = vmul.f32 %v916_v32, %v2339_v59  ;;  %v976_v59 = vrot.slane %v943_v11, 4  ;;  %v957_v61 = vadd.f32 %v956_v3, %v955_v44  ;;  %v974_v28 = vrot.slane %v973_v1, 1  ;;  %v3457_v44 = vld [vmem:[#allocation6_spill] sm:$0xff] }
 0x3aa   :  { %v964_v22 = vrot.slane %v941_v25, 4  ;;  %v1884_v50 = vsel %vm1883_vm2, %v957_v61, %v951_v6  ;;  %v975_v40 = vadd.f32 %v974_v28, %v973_v1 }
 0x3ac   :  { %v911_v56 = vpop.permute.xlu0 %910  ;;  %v965_v29 = vadd.f32 %v964_v22, %v941_v25  ;;  %v1723_v22 = vmul.f32 %v3344_v21, %v2312_v42 }
 0x3ad   :  { %v940_v55 = vmul.f32 %v911_v56, %v2328_v52  ;;  %v977_v52 = vadd.f32 %v976_v59, %v943_v11  ;;  %v3455_v11 = vld [vmem:[#allocation7_spill] sm:$0xff] }
 0x3ae   :  { %v966_v63 = vrot.slane %v965_v29, 2  ;;  %v1731_v45 = vrot.slane %v1723_v22, 4 }
 0x3af   :  { %v958_v38 = vrot.slane %v940_v55, 4  ;;  %v978_v53 = vrot.slane %v977_v52, 2 }
 0x3b0   :  { %v967_v13 = vadd.f32 %v966_v63, %v965_v29  ;;  %v3458_v63 = vld [vmem:[#allocation8_spill] sm:$0xff] }
 0x3b1   :  { %v959_v14 = vadd.f32 %v958_v38, %v940_v55  ;;  %v979_v15 = vadd.f32 %v978_v53, %v977_v52  ;;  %v1724_v55 = vmul.f32 %v3348_v26, %v2319_v46 }
 0x3b2   :  { %v968_v36 = vrot.slane %v967_v13, 1 }
 0x3b3   :  { %v960_v23 = vrot.slane %v959_v14, 2  ;;  %v980_v5 = vrot.slane %v979_v15, 1  ;;  %v1737_v17 = vrot.slane %v1724_v55, 4 }
 0x3b4   :  { %v969_v2 = vadd.f32 %v968_v36, %v967_v13 }
 0x3b5   :  { %v961_v19 = vadd.f32 %v960_v23, %v959_v14  ;;  %v981_v49 = vadd.f32 %v980_v5, %v979_v15  ;;  %v1727_v14 = vmul.f32 %v3346_v62, %v3456_v41  ;;  %v1738_v29 = vadd.f32 %v1737_v17, %v1724_v55 }
 0x3b6   :  { %v1732_v23 = vadd.f32 %v1731_v45, %v1723_v22 }
 0x3b7   :  { %v962_v24 = vrot.slane %v961_v19, 1  ;;  %v1755_v7 = vrot.slane %v1727_v14, 4  ;;  %v1739_v34 = vrot.slane %v1738_v29, 2 }
 0x3b8   :  { %v1733_v42 = vrot.slane %v1732_v23, 2 }
 0x3b9   :  { %v963_v18 = vadd.f32 %v962_v24, %v961_v19  ;;  %v1756_v21 = vadd.f32 %v1755_v7, %v1727_v14  ;;  %v1740_v3 = vadd.f32 %v1739_v34, %v1738_v29 }
 0x3ba   :  { %v1734_v53 = vadd.f32 %v1733_v42, %v1732_v23 }
 0x3bb   :  { %v1886_v39 = vsel %vm1885_vm5, %v963_v18, %v1884_v50  ;;  %v1711_v47 = vpop.permute.xlu1 %1710  ;;  %v1757_v9 = vrot.slane %v1756_v21, 2  ;;  %v1741_v36 = vrot.slane %v1740_v3, 1 }
 0x3bc   :  { %v936_v58 = vpop.permute.xlu2 %935  ;;  %v1888_v27 = vsel %vm1887_vm1, %v969_v2, %v1886_v39  ;;  %v1728_v46 = vmul.f32 %v1711_v47, %v3457_v44  ;;  %v1735_v18 = vrot.slane %v1734_v53, 1 }
 0x3bd   :  { %v945_v0 = vmul.f32 %v936_v58, %v2351_v4  ;;  %v986_v4 = vrot.slane %v985_v35, 1  ;;  %v1890_v32 = vsel %vm1889_vm3, %v975_v40, %v1888_v27  ;;  %v3460_v58 = vld [vmem:[#allocation9_spill] sm:$0xff]  ;;  %v1742_v2 = vadd.f32 %v1741_v36, %v1740_v3 }
 0x3be   :  { %v1892_v12 = vsel %vm1891_vm10, %v981_v49, %v1890_v32  ;;  %v1761_v30 = vrot.slane %v1728_v46, 4 }
 0x3bf   :  { %v988_v16 = vrot.slane %v945_v0, 4  ;;  %v987_v20 = vadd.f32 %v986_v4, %v985_v35 }
 0x3c1   :  { %v989_v33 = vadd.f32 %v988_v16, %v945_v0  ;;  %v1894_v37 = vsel %vm1893_vm15, %v987_v20, %v1892_v12  ;;  %v1762_v0 = vadd.f32 %v1761_v30, %v1728_v46 }
 0x3c3   :  { %v990_v54 = vrot.slane %v989_v33, 2  ;;  %v1696_v31 = vpop.permute.xlu1 %1695  ;;  %v1763_v28 = vrot.slane %v1762_v0, 2 }
 0x3c4   :  { %v1725_v38 = vmul.f32 %v1696_v31, %v3455_v11  ;;  %v1721_v26 = vpop.permute.xlu2 %1720 }
 0x3c5   :  { %v991_v48 = vadd.f32 %v990_v54, %v989_v33  ;;  %v1730_v51 = vmul.f32 %v1721_v26, %v3459_v57  ;;  %v1758_v33 = vadd.f32 %v1757_v9, %v1756_v21 }
 0x3c6   :  { %v1743_v43 = vrot.slane %v1725_v38, 4 }
 0x3c7   :  { %v992_v8 = vrot.slane %v991_v48, 1  ;;  %v1773_v1 = vrot.slane %v1730_v51, 4  ;;  %v1759_v49 = vrot.slane %v1758_v33, 1 }
 0x3c8   :  { %v1744_v60 = vadd.f32 %v1743_v43, %v1725_v38 }
 0x3c9   :  { %v993_v25 = vadd.f32 %v992_v8, %v991_v48  ;;  %v1774_v54 = vadd.f32 %v1773_v1, %v1730_v51  ;;  %v1736_v48 = vadd.f32 %v1735_v18, %v1734_v53  ;;  %v1760_v38 = vadd.f32 %v1759_v49, %v1758_v33 }
 0x3ca   :  { %v1745_v19 = vrot.slane %v1744_v60, 2 }
 0x3cb   :  { %v1896_v56 = vsel %vm1895_vm6, %v993_v25, %v1894_v37  ;;  %v1902_v61 = vpop.permute.xlu1 %1901  ;;  %v1775_v32 = vrot.slane %v1774_v54, 2  ;;  %v1764_v25 = vadd.f32 %v1763_v28, %v1762_v0 }
 0x3cc   :  { %1898 = vst [vmem:[#allocation2] sm:$0xff] %v1896_v56  ;;  %v1746_v10 = vadd.f32 %v1745_v19, %v1744_v60  ;;  %v1912_v5 = vpop.permute.xlu2 %1911  ;;  %v1939_v20 = vmul.f32 %v1902_v61, %v1736_v48 }
 0x3cd   :  { %v1765_v22 = vrot.slane %v1764_v25, 1  ;;  %v1776_v17 = vadd.f32 %v1775_v32, %v1774_v54 }
 0x3ce   :  { %v1747_v35 = vrot.slane %v1746_v10, 1 }
 0x3cf   :  { %v1766_v23 = vadd.f32 %v1765_v22, %v1764_v25  ;;  %v1777_v60 = vrot.slane %v1776_v17, 1 }
 0x3d0   :  { %v1748_v8 = vadd.f32 %v1747_v35, %v1746_v10 }
 0x3d2   :  { %v1941_v31 = vmul.f32 %v1912_v5, %v1748_v8 }
 0x3d3   :  { %v1917_v56 = vpop.permute.xlu1 %1916 }
 0x3db   :  { %v1932_v46 = vpop.permute.xlu1 %1931 }
 0x3df   :  { %v1716_v59 = vpop.permute.xlu0 %1715 }
 0x3e0   :  { %v1729_v52 = vmul.f32 %v1716_v59, %v3458_v63  ;;  %v1927_v59 = vpop.permute.xlu2 %1926  ;;  %v1778_v63 = vadd.f32 %v1777_v60, %v1776_v17 }
 0x3e1   :  { %v1944_v44 = vmul.f32 %v1927_v59, %v1766_v23 }
 0x3e2   :  { %v1767_v62 = vrot.slane %v1729_v52, 4 }
 0x3e4   :  { %v1768_v15 = vadd.f32 %v1767_v62, %v1729_v52 }
 0x3e6   :  { %v1769_v39 = vrot.slane %v1768_v15, 2 }
 0x3e7   :  { %v1701_v13 = vpop.permute.xlu0 %1700 }
 0x3e8   :  { %v1726_v24 = vmul.f32 %v1701_v13, %v3460_v58  ;;  %v1770_v37 = vadd.f32 %v1769_v39, %v1768_v15 }
 0x3ea   :  { %v1749_v16 = vrot.slane %v1726_v24, 4  ;;  %v1771_v45 = vrot.slane %v1770_v37, 1 }
 0x3ec   :  { %v1750_v6 = vadd.f32 %v1749_v16, %v1726_v24  ;;  %v1772_v34 = vadd.f32 %v1771_v45, %v1770_v37 }
 0x3ee   :  { %v1751_v50 = vrot.slane %v1750_v6, 2  ;;  %v1945_v52 = vmul.f32 %v1932_v46, %v1772_v34 }
 0x3ef   :  { %v1907_v4 = vpop.permute.xlu0 %1906 }
 0x3f0   :  { %v1752_v40 = vadd.f32 %v1751_v50, %v1750_v6  ;;  %v1940_v27 = vmul.f32 %v1907_v4, %v1742_v2 }
 0x3f2   :  { %v1753_v12 = vrot.slane %v1752_v40, 1  ;;  %v1955_v55 = vsel %vm1883_vm2, %v1940_v27, %v1939_v20 }
 0x3f3   :  { %v1956_v41 = vsel %vm1885_vm5, %v1941_v31, %v1955_v55 }
 0x3f4   :  { %v1754_v47 = vadd.f32 %v1753_v12, %v1752_v40 }
 0x3f6   :  { %v1942_v11 = vmul.f32 %v1917_v56, %v1754_v47 }
 0x3f7   :  { %v1922_v14 = vpop.permute.xlu0 %1921 }
 0x3f8   :  { %v1957_v43 = vsel %vm1887_vm1, %v1942_v11, %v1956_v41  ;;  %v1943_v29 = vmul.f32 %v1922_v14, %v1760_v38 }
 0x3fa   :  { %v1958_v7 = vsel %vm1889_vm3, %v1943_v29, %v1957_v43 }
 0x3fb   :  { %v1959_v26 = vsel %vm1891_vm10, %v1944_v44, %v1958_v7 }
 0x3fc   :  { %v1960_v19 = vsel %vm1893_vm15, %v1945_v52, %v1959_v26 }
 0x3ff   :  { %v1937_v42 = vpop.permute.xlu0 %1936 }
 0x400   :  { %v1946_v21 = vmul.f32 %v1937_v42, %v1778_v63 }
 0x402   :  { %v1961_v30 = vsel %vm1895_vm6, %v1946_v21, %v1960_v19 }
 0x403   :  { %1963 = vst [vmem:[#allocation2 + $0x8] sm:$0xff] %v1961_v30 }
 0x404   :  { %1974 = dma.vmem_to_hbm [thread:$0]  %s1970_s23, 256, %s1972_s26, [#allocation3]  }
 0x405   :  { %2210 = dma.done.wait [#allocation3], 256  }
 0x406   :  { %2211 = vsyncadd [#allocation3], 4294967040 }
 0x407   :  { %1979 = vsyncpa [#allocation3], 1 }

</bundles_post_ra>
